<compile_context>
chip_gen: v5e
topology: v5e:2x2
jax: 0.10.0
libtpu: 0.0.40
codegen_flags: <defaults>
</compile_context>

<pallas_src>
import jax
import jax.numpy as jnp
from jax import lax
from jax.experimental import pallas as pl
from jax.experimental.pallas import tpu as pltpu

CIFAR_MEAN = (0.4914, 0.4822, 0.4465)
CIFAR_STD = (0.2471, 0.2435, 0.2616)
P_FLIP = 0.75
P_SHUFFLE = 0.75
P_TPS = 0.75
TPS_SCALE = 0.2

TILE_P = 128  # output-pixel (lane) tile width for the S^T build / resample matmul


# ---------------------------------------------------------------------------
# Pallas kernel: per-sample fused (normalize+shuffle) affine -> tiled 4-tap resample
# ---------------------------------------------------------------------------
def _aug_kernel(x_ref, idx_ref, wgt_ref, aff_ref, bias_ref, o_ref):
    B, C, HWP = x_ref.shape
    n_tiles = HWP // TILE_P
    # source-pixel index q on sublanes; broadcasts against (1, TILE_P) tap rows.
    q_iota = lax.broadcasted_iota(jnp.int32, (HWP, 1), 0)

    @pl.loop(0, B)
    def _(b):
        # fused normalize + random channel shuffle: xp = A @ x + bias   -> (C, HWP)
        xp = jnp.dot(aff_ref[b], x_ref[b],
                     preferred_element_type=jnp.float32) + bias_ref[b]
        xp16 = xp.astype(jnp.bfloat16)

        @pl.loop(0, n_tiles)
        def _(t):
            p0 = pl.multiple_of(t * TILE_P, TILE_P)
            idxt = idx_ref[b, :, pl.ds(p0, TILE_P)]          # (4, TILE_P) int32
            wt = wgt_ref[b, :, pl.ds(p0, TILE_P)]            # (4, TILE_P) f32
            # S^T tile: st[q, p] = sum_tap w[tap, p] * (q == idx[tap, p])  -> (HWP, TILE_P)
            st = jnp.where(q_iota == idxt[0:1, :], wt[0:1, :], 0.0)
            for tap in range(1, 4):
                st = st + jnp.where(q_iota == idxt[tap:tap + 1, :], wt[tap:tap + 1, :], 0.0)
            # composed flip + thin-plate-spline bilinear resample (MXU), lane-aligned store
            o_ref[b, :, pl.ds(p0, TILE_P)] = jnp.dot(
                xp16, st.astype(jnp.bfloat16),
                preferred_element_type=jnp.float32).astype(o_ref.dtype)


# ---------------------------------------------------------------------------
# Glue: thin-plate-spline warp field + sparse 4-tap bilinear tables
# ---------------------------------------------------------------------------
def _tps_radial(d2):
    # U(r) = r^2 log(r), expressed via squared distance; U(0) = 0
    return jnp.where(d2 > 0.0, 0.5 * d2 * jnp.log(d2 + 1e-12), 0.0)


def _tps_source_grid(dst_ctrl, src_ctrl, out_xy):
    """Fit TPS f with f(dst_ctrl_i) = src_ctrl_i, evaluate at out_xy -> source coords."""
    k = dst_ctrl.shape[0]
    d2 = jnp.sum((dst_ctrl[:, None, :] - dst_ctrl[None, :, :]) ** 2, axis=-1)
    kmat = _tps_radial(d2) + 1e-6 * jnp.eye(k, dtype=jnp.float32)
    pmat = jnp.concatenate([jnp.ones((k, 1), jnp.float32), dst_ctrl], axis=1)        # (k, 3)
    amat = jnp.block([[kmat, pmat], [pmat.T, jnp.zeros((3, 3), jnp.float32)]])
    rhs = jnp.concatenate([src_ctrl, jnp.zeros((3, 2), jnp.float32)], axis=0)
    params = jnp.linalg.solve(amat, rhs)                                             # (k+3, 2)
    w, a = params[:k], params[k:]
    d2o = jnp.sum((out_xy[:, None, :] - dst_ctrl[None, :, :]) ** 2, axis=-1)         # (HW, k)
    u = _tps_radial(d2o)
    po = jnp.concatenate([jnp.ones((out_xy.shape[0], 1), jnp.float32), out_xy], axis=1)
    return u @ w + po @ a                                                            # (HW, 2)


def _bilinear_taps(sx, sy, H, W):
    """Sparse bilinear sampling: idx (4, HW) int32, w (4, HW) f32; OOB taps -> weight 0."""
    x0 = jnp.floor(sx)
    y0 = jnp.floor(sy)
    fx = sx - x0
    fy = sy - y0
    x0i = x0.astype(jnp.int32)
    y0i = y0.astype(jnp.int32)
    idxs, wgts = [], []
    for dy, dx in ((0, 0), (0, 1), (1, 0), (1, 1)):
        xi = x0i + dx
        yi = y0i + dy
        wgt = (fx if dx else (1.0 - fx)) * (fy if dy else (1.0 - fy))
        valid = (xi >= 0) & (xi < W) & (yi >= 0) & (yi < H)
        idxs.append(jnp.where(valid, yi * W + xi, 0).astype(jnp.int32))
        wgts.append(jnp.where(valid, wgt, 0.0).astype(jnp.float32))
    return jnp.stack(idxs, axis=0), jnp.stack(wgts, axis=0)


def _build_sample_tables(key, H, W, C):
    """Per-sample: 4-tap warp tables (flip+TPS composed) and fused normalize+shuffle affine."""
    k_flip, k_shuf_on, k_shuf_perm, k_tps_on, k_tps_noise = jax.random.split(key, 5)
    flip = jax.random.bernoulli(k_flip, P_FLIP)
    tps_on = jax.random.bernoulli(k_tps_on, P_TPS)
    shuf_on = jax.random.bernoulli(k_shuf_on, P_SHUFFLE)

    # output pixel grid in normalized [-1, 1] coords (align_corners=True convention)
    ys = jnp.linspace(-1.0, 1.0, H, dtype=jnp.float32)
    xs = jnp.linspace(-1.0, 1.0, W, dtype=jnp.float32)
    gy, gx = jnp.meshgrid(ys, xs, indexing="ij")
    out_xy = jnp.stack([gx.ravel(), gy.ravel()], axis=-1)                  # (HW, 2)

    # 3x3 control-point grid, perturbed destination points
    cy, cx = jnp.meshgrid(jnp.linspace(-1.0, 1.0, 3), jnp.linspace(-1.0, 1.0, 3), indexing="ij")
    ctrl = jnp.stack([cx.ravel(), cy.ravel()], axis=-1).astype(jnp.float32)  # (9, 2)
    dst = ctrl + jax.random.uniform(k_tps_noise, ctrl.shape, jnp.float32,
                                    minval=-TPS_SCALE, maxval=TPS_SCALE)

    src_xy_tps = _tps_source_grid(dst, ctrl, out_xy)
    src_xy = jnp.where(tps_on, src_xy_tps, out_xy)

    # normalized -> pixel coordinates; flip happens BEFORE the TPS warp in the pipeline,
    # so it folds into the source x coordinate of the composed warp.
    sx = (src_xy[:, 0] + 1.0) * 0.5 * (W - 1)
    sy = (src_xy[:, 1] + 1.0) * 0.5 * (H - 1)
    sx = jnp.where(flip, (W - 1) - sx, sx)

    idx, wgt = _bilinear_taps(sx, sy, H, W)                                # (4, HW) each

    # fused Normalize + RandomChannelShuffle as one tiny affine: xp = A @ x + b
    perm = jax.random.permutation(k_shuf_perm, C)
    perm = jnp.where(shuf_on, perm, jnp.arange(C))
    mean = jnp.asarray(CIFAR_MEAN, jnp.float32)
    stdinv = 1.0 / jnp.asarray(CIFAR_STD, jnp.float32)
    mean_p, stdinv_p = mean[perm], stdinv[perm]
    aff = jax.nn.one_hot(perm, C, dtype=jnp.float32) * stdinv_p[:, None]   # (C, C)
    bias = (-mean_p * stdinv_p)[:, None]                                   # (C, 1)
    return idx, wgt, aff, bias


def _pick_block_n(N):
    """Samples per grid step: prefer an even grid (v7x 2-TC balance), then larger B."""
    for require_even in (True, False):
        for b in (8, 4, 2, 1):
            if N % b == 0 and N // b >= 2 and (not require_even or (N // b) % 2 == 0):
                return b
    return 1


# ---------------------------------------------------------------------------
# Wrapper
# ---------------------------------------------------------------------------
def data_augmentation(x, key, apply_color_jitter=False):
    """x: (N, C, H, W) float32, NCHW (PyTorch convention)."""
    N, C, H, W = x.shape
    assert C == 3, "Normalize stats are RGB (3-channel)."
    HW = H * W
    HWP = ((HW + 127) // 128) * 128          # lane-dense, multiple-of-128 pixel axis
    B = _pick_block_n(N)

    keys = jax.random.split(key, N)
    idx, wgt, aff, bias = jax.vmap(lambda k: _build_sample_tables(k, H, W, C))(keys)
    # (N,4,HW), (N,4,HW), (N,C,C), (N,C,1)

    x_flat = x.reshape(N, C, HW).astype(jnp.float32)
    if HWP != HW:
        pad = HWP - HW
        x_flat = jnp.pad(x_flat, ((0, 0), (0, 0), (0, pad)))
        idx = jnp.pad(idx, ((0, 0), (0, 0), (0, pad)))
        wgt = jnp.pad(wgt, ((0, 0), (0, 0), (0, pad)))

    # VMEM budget: double-buffered in/out blocks + per-tile (HWP, TILE_P) S^T temporaries.
    # Cap well below v7x's 64 MiB per-core VMEM.
    block_bytes = 4 * B * (2 * C * HWP + 8 * HWP + C * C + C)
    tile_scratch = 4 * (2 * HWP * TILE_P + 4 * C * HWP)
    vmem_limit = int(min(max(4 * block_bytes + tile_scratch, 16 << 20), 48 << 20))

    out = pl.pallas_call(
        _aug_kernel,
        out_shape=jax.ShapeDtypeStruct((N, C, HWP), jnp.float32),
        grid=(N // B,),
        in_specs=[
            pl.BlockSpec((B, C, HWP), lambda n: (n, 0, 0)),
            pl.BlockSpec((B, 4, HWP), lambda n: (n, 0, 0)),
            pl.BlockSpec((B, 4, HWP), lambda n: (n, 0, 0)),
            pl.BlockSpec((B, C, C), lambda n: (n, 0, 0)),
            pl.BlockSpec((B, C, 1), lambda n: (n, 0, 0)),
        ],
        out_specs=pl.BlockSpec((B, C, HWP), lambda n: (n, 0, 0)),
        compiler_params=pltpu.CompilerParams(
            dimension_semantics=("parallel",),
            vmem_limit_bytes=vmem_limit,
        ),
    )(x_flat, idx, wgt, aff, bias)

    # TODO(synk): ColorJitter branch not implemented — module default apply_color_jitter=False.
    # TODO(synk): for large images, band-limit the source (q) range per output tile
    #             (scalar-prefetched q-offsets) to cut the remaining O(HW^2) select/matmul work.
    return out[:, :, :HW].reshape(N, C, H, W)


if __name__ == "__main__":
    key = jax.random.PRNGKey(0)
    k_x, k_aug = jax.random.split(key)
    # CIFAR-like small input: batch=2, 3 RGB channels, 16x16 spatial, NCHW
    x = jax.random.uniform(k_x, (2, 3, 16, 16), jnp.float32)
    y = jax.jit(data_augmentation)(x, k_aug)
    jax.block_until_ready(y)
    assert y.shape == x.shape and y.dtype == jnp.float32
    print("KERNEL_OK")
</pallas_src>

<mosaic_0001>
module attributes {stable_mosaic.version = 11 : i64} {
  func.func @_aug_kernel(%arg0: i32, %arg1: memref<1x3x256xf32, #tpu.memory_space<vmem>>, %arg2: memref<1x4x256xi32, #tpu.memory_space<vmem>>, %arg3: memref<1x4x256xf32, #tpu.memory_space<vmem>>, %arg4: memref<1x3x3xf32, #tpu.memory_space<vmem>>, %arg5: memref<1x3x1xf32, #tpu.memory_space<vmem>>, %arg6: memref<1x3x256xf32, #tpu.memory_space<vmem>>) attributes {dimension_semantics = [#tpu.dimension_semantics<parallel>], iteration_bounds = array<i64: 2>, scalar_prefetch = 0 : i64, scratch_operands = 0 : i64, tpu.core_type = #tpu.core_type<tc>, window_params = [{transform_indices = @transform_0, window_bounds = array<i64: 1, 3, 256>}, {transform_indices = @transform_1, window_bounds = array<i64: 1, 4, 256>}, {transform_indices = @transform_2, window_bounds = array<i64: 1, 4, 256>}, {transform_indices = @transform_3, window_bounds = array<i64: 1, 3, 3>}, {transform_indices = @transform_4, window_bounds = array<i64: 1, 3, 1>}, {transform_indices = @transform_5, window_bounds = array<i64: 1, 3, 256>}]} {
    %0 = tpu.iota {dimensions = array<i32: 0>} : vector<256x1xi32>
    %c0_i32 = arith.constant 0 : i32
    %c1_i32 = arith.constant 1 : i32
    %1 = arith.muli %c0_i32, %c1_i32 : i32
    %c0_i32_0 = arith.constant 0 : i32
    %2 = arith.addi %c0_i32_0, %1 : i32
    %3 = arith.index_cast %2 : i32 to index
    %c0 = arith.constant 0 : index
    %c0_1 = arith.constant 0 : index
    %4 = vector.load %arg4[%3, %c0, %c0_1] : memref<1x3x3xf32, #tpu.memory_space<vmem>>, vector<1x3x3xf32>
    %5 = vector.shape_cast %4 : vector<1x3x3xf32> to vector<3x3xf32>
    %6 = arith.index_cast %2 : i32 to index
    %c0_2 = arith.constant 0 : index
    %c0_3 = arith.constant 0 : index
    %7 = vector.load %arg1[%6, %c0_2, %c0_3] : memref<1x3x256xf32, #tpu.memory_space<vmem>>, vector<1x3x256xf32>
    %8 = vector.shape_cast %7 : vector<1x3x256xf32> to vector<3x256xf32>
    %cst = arith.constant dense<0.000000e+00> : vector<3x256xf32>
    %9 = tpu.matmul %5, %8, %cst {dimension_numbers = #tpu.dot_dimension_numbers<[1], [0], [0], [1], [0, 0, 1, 1], [], []>} : vector<3x3xf32>, vector<3x256xf32>, vector<3x256xf32> -> vector<3x256xf32>
    %10 = arith.index_cast %2 : i32 to index
    %c0_4 = arith.constant 0 : index
    %c0_5 = arith.constant 0 : index
    %11 = vector.load %arg5[%10, %c0_4, %c0_5] : memref<1x3x1xf32, #tpu.memory_space<vmem>>, vector<1x3x1xf32>
    %12 = vector.shape_cast %11 : vector<1x3x1xf32> to vector<3x1xf32>
    %13 = vector.broadcast %12 : vector<3x1xf32> to vector<3x256xf32>
    %14 = arith.addf %9, %13 : vector<3x256xf32>
    %15 = arith.truncf %14 : vector<3x256xf32> to vector<3x256xbf16>
    %c0_i32_6 = arith.constant 0 : i32
    %c2_i32 = arith.constant 2 : i32
    %16 = arith.addi %c0_i32_6, %c2_i32 : i32
    %c1_i32_7 = arith.constant 1 : i32
    scf.for %arg7 = %c0_i32_6 to %16 step %c1_i32_7  : i32 {
      %c1_i32_10 = arith.constant 1 : i32
      %17 = arith.muli %arg7, %c1_i32_10 : i32
      %c0_i32_11 = arith.constant 0 : i32
      %18 = arith.addi %c0_i32_11, %17 : i32
      %c128_i32 = arith.constant 128 : i32
      %19 = arith.muli %18, %c128_i32 : i32
      %20 = tpu.assume_multiple %19, 128 : i32
      %21 = arith.index_cast %2 : i32 to index
      %c0_12 = arith.constant 0 : index
      %22 = arith.index_cast %20 : i32 to index
      %23 = vector.load %arg2[%21, %c0_12, %22] : memref<1x4x256xi32, #tpu.memory_space<vmem>>, vector<1x4x128xi32>
      %24 = vector.shape_cast %23 : vector<1x4x128xi32> to vector<4x128xi32>
      %25 = arith.index_cast %2 : i32 to index
      %c0_13 = arith.constant 0 : index
      %26 = arith.index_cast %20 : i32 to index
      %27 = vector.load %arg3[%25, %c0_13, %26] : memref<1x4x256xf32, #tpu.memory_space<vmem>>, vector<1x4x128xf32>
      %28 = vector.shape_cast %27 : vector<1x4x128xf32> to vector<4x128xf32>
      %29 = vector.extract_strided_slice %24 {offsets = [0, 0], sizes = [1, 128], strides = [1, 1]} : vector<4x128xi32> to vector<1x128xi32>
      %30 = vector.broadcast %0 : vector<256x1xi32> to vector<256x128xi32>
      %31 = vector.broadcast %29 : vector<1x128xi32> to vector<256x128xi32>
      %32 = arith.cmpi eq, %30, %31 : vector<256x128xi32>
      %33 = vector.extract_strided_slice %28 {offsets = [0, 0], sizes = [1, 128], strides = [1, 1]} : vector<4x128xf32> to vector<1x128xf32>
      %cst_14 = arith.constant 0.000000e+00 : f32
      %34 = vector.shape_cast %33 : vector<1x128xf32> to vector<1x128xf32>
      %35 = vector.broadcast %34 : vector<1x128xf32> to vector<256x128xf32>
      %36 = vector.broadcast %cst_14 : f32 to vector<256x128xf32>
      %37 = arith.select %32, %35, %36 : vector<256x128xi1>, vector<256x128xf32>
      %38 = vector.extract_strided_slice %24 {offsets = [1, 0], sizes = [1, 128], strides = [1, 1]} : vector<4x128xi32> to vector<1x128xi32>
      %39 = vector.broadcast %0 : vector<256x1xi32> to vector<256x128xi32>
      %40 = vector.broadcast %38 : vector<1x128xi32> to vector<256x128xi32>
      %41 = arith.cmpi eq, %39, %40 : vector<256x128xi32>
      %42 = vector.extract_strided_slice %28 {offsets = [1, 0], sizes = [1, 128], strides = [1, 1]} : vector<4x128xf32> to vector<1x128xf32>
      %cst_15 = arith.constant 0.000000e+00 : f32
      %43 = vector.shape_cast %42 : vector<1x128xf32> to vector<1x128xf32>
      %44 = vector.broadcast %43 : vector<1x128xf32> to vector<256x128xf32>
      %45 = vector.broadcast %cst_15 : f32 to vector<256x128xf32>
      %46 = arith.select %41, %44, %45 : vector<256x128xi1>, vector<256x128xf32>
      %47 = arith.addf %37, %46 : vector<256x128xf32>
      %48 = vector.extract_strided_slice %24 {offsets = [2, 0], sizes = [1, 128], strides = [1, 1]} : vector<4x128xi32> to vector<1x128xi32>
      %49 = vector.broadcast %0 : vector<256x1xi32> to vector<256x128xi32>
      %50 = vector.broadcast %48 : vector<1x128xi32> to vector<256x128xi32>
      %51 = arith.cmpi eq, %49, %50 : vector<256x128xi32>
      %52 = vector.extract_strided_slice %28 {offsets = [2, 0], sizes = [1, 128], strides = [1, 1]} : vector<4x128xf32> to vector<1x128xf32>
      %cst_16 = arith.constant 0.000000e+00 : f32
      %53 = vector.shape_cast %52 : vector<1x128xf32> to vector<1x128xf32>
      %54 = vector.broadcast %53 : vector<1x128xf32> to vector<256x128xf32>
      %55 = vector.broadcast %cst_16 : f32 to vector<256x128xf32>
      %56 = arith.select %51, %54, %55 : vector<256x128xi1>, vector<256x128xf32>
      %57 = arith.addf %47, %56 : vector<256x128xf32>
      %58 = vector.extract_strided_slice %24 {offsets = [3, 0], sizes = [1, 128], strides = [1, 1]} : vector<4x128xi32> to vector<1x128xi32>
      %59 = vector.broadcast %0 : vector<256x1xi32> to vector<256x128xi32>
      %60 = vector.broadcast %58 : vector<1x128xi32> to vector<256x128xi32>
      %61 = arith.cmpi eq, %59, %60 : vector<256x128xi32>
      %62 = vector.extract_strided_slice %28 {offsets = [3, 0], sizes = [1, 128], strides = [1, 1]} : vector<4x128xf32> to vector<1x128xf32>
      %cst_17 = arith.constant 0.000000e+00 : f32
      %63 = vector.shape_cast %62 : vector<1x128xf32> to vector<1x128xf32>
      %64 = vector.broadcast %63 : vector<1x128xf32> to vector<256x128xf32>
      %65 = vector.broadcast %cst_17 : f32 to vector<256x128xf32>
      %66 = arith.select %61, %64, %65 : vector<256x128xi1>, vector<256x128xf32>
      %67 = arith.addf %57, %66 : vector<256x128xf32>
      %68 = arith.truncf %67 : vector<256x128xf32> to vector<256x128xbf16>
      %cst_18 = arith.constant dense<0.000000e+00> : vector<3x128xf32>
      %69 = tpu.matmul %15, %68, %cst_18 {dimension_numbers = #tpu.dot_dimension_numbers<[1], [0], [0], [1], [0, 0, 1, 1], [], []>} : vector<3x256xbf16>, vector<256x128xbf16>, vector<3x128xf32> -> vector<3x128xf32>
      %70 = arith.index_cast %2 : i32 to index
      %c0_19 = arith.constant 0 : index
      %71 = arith.index_cast %20 : i32 to index
      %72 = vector.load %arg6[%70, %c0_19, %71] : memref<1x3x256xf32, #tpu.memory_space<vmem>>, vector<1x3x128xf32>
      %73 = vector.shape_cast %72 : vector<1x3x128xf32> to vector<3x128xf32>
      %74 = vector.shape_cast %69 : vector<3x128xf32> to vector<1x3x128xf32>
      tpu.vector_store %arg6[%70, %c0_19, %71], %74 {strides = array<i32>} : memref<1x3x256xf32, #tpu.memory_space<vmem>>, vector<1x3x128xf32>,
    }
    %c2_i32_8 = arith.constant 2 : i32
    %c1_i32_9 = arith.constant 1 : i32
    return
  }
  func.func @transform_0(%arg0: i32) -> (i32, i32, i32) {
    %c0_i32 = arith.constant 0 : i32
    %c0_i32_0 = arith.constant 0 : i32
    %c0_i32_1 = arith.constant 0 : i32
    return %arg0, %c0_i32, %c0_i32_0 : i32, i32, i32
  }
  func.func @transform_1(%arg0: i32) -> (i32, i32, i32) {
    %c0_i32 = arith.constant 0 : i32
    %c0_i32_0 = arith.constant 0 : i32
    %c0_i32_1 = arith.constant 0 : i32
    return %arg0, %c0_i32, %c0_i32_0 : i32, i32, i32
  }
  func.func @transform_2(%arg0: i32) -> (i32, i32, i32) {
    %c0_i32 = arith.constant 0 : i32
    %c0_i32_0 = arith.constant 0 : i32
    %c0_i32_1 = arith.constant 0 : i32
    return %arg0, %c0_i32, %c0_i32_0 : i32, i32, i32
  }
  func.func @transform_3(%arg0: i32) -> (i32, i32, i32) {
    %c0_i32 = arith.constant 0 : i32
    %c0_i32_0 = arith.constant 0 : i32
    %c0_i32_1 = arith.constant 0 : i32
    return %arg0, %c0_i32, %c0_i32_0 : i32, i32, i32
  }
  func.func @transform_4(%arg0: i32) -> (i32, i32, i32) {
    %c0_i32 = arith.constant 0 : i32
    %c0_i32_0 = arith.constant 0 : i32
    %c0_i32_1 = arith.constant 0 : i32
    return %arg0, %c0_i32, %c0_i32_0 : i32, i32, i32
  }
  func.func @transform_5(%arg0: i32) -> (i32, i32, i32) {
    %c0_i32 = arith.constant 0 : i32
    %c0_i32_0 = arith.constant 0 : i32
    %c0_i32_1 = arith.constant 0 : i32
    return %arg0, %c0_i32, %c0_i32_0 : i32, i32, i32
  }
}

</mosaic_0001>

<bundles_post_ra>
// kernel: neg.3
= control target key start
LH: loop header
LB: loop body
LE: loop exit
PB: predicated region body
PF: predicated region fallthrough
CT: control target
= control target key end

     0   :  { %s24_s0 = inlined_call_operand.vmem [shape: f32[6], index: 0, kind: input, shape index: {}]   ;;  %s25_s1 = inlined_call_operand.vmem [shape: f32[6], index: 1, kind: output, shape index: {}]  }
   0x1   :  { %v2_v0 = vld [vmem:[%s24_s0] sm:$0x1] }
   0x2   :  { %v5_v1 = vxor.u32 2147483648, %v2_v0 }
   0x4   :  { %7 = vst [vmem:[%s25_s1] sm:$0x1] %v5_v1 }

// kernel: custom-call.8
= control target key start
LH: loop header
LB: loop body
LE: loop exit
PB: predicated region body
PF: predicated region fallthrough
CT: control target
= control target key end

     0   :  { %5 = vsyncpa [#allocation4], 0  ;;  %s990_s0 = inlined_call_operand.vmem [shape: f32[2,12,12], index: 0, kind: input, shape index: {}]   ;;  %s991_s1 = inlined_call_operand.vmem [shape: f32[2,12,12], index: 1, kind: output, shape index: {0}]   ;;  %s992_s2 = inlined_call_operand.hbm [shape: s32[2,12], index: 2, kind: output, shape index: {1}]   ;;  %s993_s3 = inlined_call_operand.vmem [shape: s32[2,12], index: 3, kind: output, shape index: {2}]  }
   0x1   :  { %7 = vsyncpa [#allocation4 + $0x1], 0  ;;  %s784_s12 = smov 0   ;;  %s786_s13 = smov 0  }
   0x2   :  { %s788_s14 = smov 0   ;;  %s790_s15 = smov 0  }
   0x3 LB: > { %s805_s16 = sadd.s32 4294967295, %s753_s15   ;;  %s595_s17 = sadd.s32 4294967294, %s753_s15   ;;  %s753_s15 = sphi %s790_s15, %s999_s15   ;;  %s749_s14 = sphi %s788_s14, %s998_s14   ;;  %s745_s13 = sphi %s786_s13, %s997_s13   ;;  %s741_s12 = sphi %s784_s12, %s996_s12  }
   0x4   : > { %s809_s18 = sadd.s32 1, %s753_s15   ;;  %s17_s19 = sshrl.u32 %s753_s15, 3 }
   0x5   : > { %s18_s20 = sshrl.u32 %s809_s18, 3  ;;  %s22_s21 = sadd.s32 1, %s749_s14 }
   0x6   : > { %s19_s22 = ssub.s32 %s17_s19, %s18_s20  ;;  %p32_p0 = scmp.ne.s32.totalorder %s749_s14, %s745_s13 }
   0x7   : > { %p20_p1 = scmp.eq.s32.totalorder %s19_s22, 0  ;;  %p33_p2 = scmp.eq.s32.totalorder %s805_s16, 1 }
   0x8   : > { %p38_p3 = scmp.ne.s32.totalorder %s745_s13, %s741_s12  ;;  %p39_p4 = scmp.eq.s32.totalorder %s595_s17, 1 }
   0x9   : > { %s820_s23 = scalar_select %p20_p1, %s749_s14, %s22_s21  }
   0xa   : > { %p822_p5 = por %p33_p2, %p32_p0  ;;  %p826_p6 = por %p39_p4, %p38_p3 }
   0xb   : > { %p597_p7 = scmp.ge.s32.totalorder %s753_s15, 2 }
   0xc   : > { %s85_s26 = sand.u32 (!%p597_p7), 1, %s753_s15   ;;  %s599_s27 = sshll.u32 (!%p597_p7), %s753_s15, 4 }
   0xd   : > { %83 = sbr.rel (%p597_p7) target bundleno = 21 (0x15), region = 16  ;;  %s598_s28 = sshll.u32 (!%p597_p7), %s85_s26, 4 }
   0xe   : > { %s89_s4 = scalar_lea.vmem (!%p597_p7), %s990_s0, %s599_s27  ;;  %s87_s5 = scalar_lea.vmem (!%p597_p7), [#allocation0], %s598_s28 }
  0x12   : > { %v102_v0 = vld [vmem:[%s89_s4] sm:$0xff]  ;;  %v104_v1 = vld [vmem:[%s89_s4 + $0x8] sm:$0xff] }
  0x13   : > { %103 = vst [vmem:[%s87_s5] sm:$0xff] %v102_v0 }
  0x14   : > { %105 = vst [vmem:[%s87_s5 + $0x8] sm:$0xff] %v104_v1 }
  0x15 PF: > { %p600_p8 = scmp.ge.s32.totalorder %s753_s15, 1  ;;  %p110_p9 = scmp.lt.s32.totalorder %s753_s15, 3 }
  0x17   : > { %p111_p10 = pnand %p600_p8, %p110_p9 }
  0x19   : > { %114 = sbr.rel (%p111_p10) target bundleno = 485 (0x1e5), region = 39 }
  0x1e   : > { %s117_s6 = sand.u32 1, %s805_s16   ;;  %s132_s7 = sand.u32 1, %s745_s13   ;;  %v154_v2 = vlaneseq  ;;  %v763_v6 = vmov 0  }
  0x1f   : > { %s601_s8 = sshll.u32 %s117_s6, 4  ;;  %s844_s9 = sshll.u32 %s132_s7, 1 }
  0x20   : > { %v847_v3 = vshrl.u32 %v154_v2, 7  ;;  %s119_s10 = scalar_lea.vmem [#allocation0], %s601_s8  ;;  %s849_s11 = scalar_lea.vmem [#allocation1], %s601_s8 }
  0x21   : > { %v143_v4 = vld [vmem:[%s119_s10] sm:$0xff]  ;;  %v605_v5 = vld [vmem:[%s119_s10 + $0x8] sm:$0xff]  ;;  %s149_s17 = sand.u32 7, %s805_s16   ;;  %s134_s20 = scalar_lea.vmem [#allocation3], %s844_s9 }
  0x22   : > { %144 = vst [vmem:[%s849_s11] sm:$0xff] %v143_v4  ;;  %s854_s19 = scalar_lea.vmem [#allocation2], %s149_s17  ;;  %s140_s21 = scalar_lea.vmem [#allocation6], %s844_s9 }
  0x23   : > { %606 = vst [vmem:[%s849_s11 + $0x8] sm:$0xff] %v605_v5  ;;  %s859_s22 = scalar_lea.vmem [#allocation5], %s149_s17  ;;  %s755_s26 = smov 0  }
  0x24   : > { %153 = vst [vmem:[%s854_s19] sm:$0x1] %v763_v6 }
  0x25 LB: >> { %s607_s27 = sshll.u32 %s757_s26, 3  ;;  %s162_s26 = sadd.s32 1, %s757_s26   ;;  %s757_s26 = sphi %s755_s26, %s162_s26  }
  0x26   : >> { %v166_v7 = vstv %s607_s27  ;;  %s164_s28 = scalar_lea.vmem [#allocation7], %s607_s27  ;;  %p159_p11 = scmp.ge.s32.totalorder %s162_s26, 2  }
  0x27   : >> { %v167_v8 = vadd.s32 %v166_v7, %v847_v3  ;;  %s862_s29 = smov (%p159_p11), 0  }
  0x28   : > { %161 = sbr.rel (!%p159_p11) target bundleno = 37 (0x25), region = 191 }
  0x29   : >> { %168 = vst [vmem:[%s164_s28] sm:$0xff] %v167_v8 }
  0x2d LB: >> { %v179_v9 = vld [vmem:[%s849_s11] sm:$0xff]  ;;  %v610_v10 = vld [vmem:[%s849_s11 + $0x8] sm:$0xff]  ;;  %v870_v11 = vadd.s32 8, %v847_v3  ;;  %v873_v13 = vstv %s761_s29  ;;  %s237_s30 = ssub.s32 128, %s761_s29  ;;  %v885_v47 = vand.u32 127, %v154_v2  ;;  %s249_s4 = scalar_lea.vmem %s849_s11, %s761_s29 [#allocation1]  ;;  %s761_s29 = sphi %s862_s29, %s174_s29  }
  0x2e   : >> { %v180_v12 = vand.u32 2147483647, %v179_v9  ;;  %v192_v14 = vand.u32 2147483647, %v610_v10  ;;  %vm183_vm1 = vcmp.ge.s32.totalorder %v847_v3, %v873_v13  ;;  %v246_v48 = vld [vmem:[%s854_s19] ss:$0 sm:$0xff] }
  0x2f   : >> { %vm196_vm0 = vcmp.lt.s32.totalorder %v870_v11, 12  ;;  %vm195_vm3 = vcmp.ge.s32.totalorder %v870_v11, %v873_v13  ;;  %vm244_vm15 = vcmp.eq.s32.totalorder %v885_v47, %v873_v13  ;;  %v251_v49 = vld [vmem:[%s249_s4] ss:$0 sm:$0xff]  ;;  %s255_s8 = scalar_lea.vmem [#allocation7], %s761_s29  ;;  %s174_s29 = sadd.s32 1, %s761_s29  }
  0x30   : >> { %vm609_vm2 = vcmp.gt.f32.partialorder %v180_v12, -inf  ;;  %vm197_vm5 = vmand %vm195_vm3, %vm196_vm0  ;;  %v257_v53 = vld [vmem:[%s255_s8] ss:$0 sm:$0xff]  ;;  %p171_p12 = scmp.ge.s32.totalorder %s174_s29, 12  }
  0x31   : >> { %vm187_vm4 = vmand %vm183_vm1, %vm609_vm2  ;;  %vm303_vm1 = vcmp.gt.s32.totalorder %v870_v11, %v873_v13  ;;  %vm275_vm2 = vcmp.gt.s32.totalorder %v847_v3, %v873_v13  ;;  %s426_s17 = sshrl.u32 (%p171_p12), %s805_s16, 3 }
  0x32   : >> { %v188_v15 = vsel %vm187_vm4, %v847_v3, %v873_v13  ;;  %v189_v16 = vsel %vm187_vm4, %v180_v12, -inf  ;;  %s933_s26 = sshll.u32 (%p171_p12), %s426_s17, 1 }
  0x33   : >> { %vm198_vm6 = vcmp.lt.f32.partialorder %v189_v16, %v192_v14  ;;  %s430_s29 = scalar_lea.hbm (%p171_p12), %s992_s2, %s933_s26 }
  0x34   : >> { %vm199_vm7 = vmand %vm197_vm5, %vm198_vm6 }
  0x35   : >> { %v200_v17 = vsel %vm199_vm7, %v870_v11, %v188_v15  ;;  %v201_v18 = vsel %vm199_vm7, %v192_v14, %v189_v16 }
  0x36   : >> { %v202_v19 = vrot.slane %v201_v18, 1  ;;  %v203_v20 = vrot.slane %v200_v17, 1 }
  0x38   : >> { %vm204_vm8 = vcmp.ge.f32.partialorder %v202_v19, %v201_v18  ;;  %v207_v21 = vrot.slane %v202_v19, 1  ;;  %v208_v22 = vrot.slane %v203_v20, 1 }
  0x39   : >> { %v205_v23 = vsel %vm204_vm8, %v202_v19, %v201_v18  ;;  %v206_v24 = vsel %vm204_vm8, %v203_v20, %v200_v17 }
  0x3a   : >> { %vm209_vm9 = vcmp.ge.f32.partialorder %v207_v21, %v205_v23  ;;  %v212_v25 = vrot.slane %v207_v21, 1  ;;  %v213_v26 = vrot.slane %v208_v22, 1 }
  0x3b   : >> { %v210_v27 = vsel %vm209_vm9, %v207_v21, %v205_v23  ;;  %v211_v28 = vsel %vm209_vm9, %v208_v22, %v206_v24 }
  0x3c   : >> { %vm214_vm10 = vcmp.ge.f32.partialorder %v212_v25, %v210_v27  ;;  %v217_v29 = vrot.slane %v212_v25, 1  ;;  %v218_v30 = vrot.slane %v213_v26, 1 }
  0x3d   : >> { %v215_v31 = vsel %vm214_vm10, %v212_v25, %v210_v27  ;;  %v216_v32 = vsel %vm214_vm10, %v213_v26, %v211_v28 }
  0x3e   : >> { %vm219_vm11 = vcmp.ge.f32.partialorder %v217_v29, %v215_v31  ;;  %v222_v33 = vrot.slane %v217_v29, 1  ;;  %v223_v34 = vrot.slane %v218_v30, 1 }
  0x3f   : >> { %v220_v35 = vsel %vm219_vm11, %v217_v29, %v215_v31  ;;  %v221_v36 = vsel %vm219_vm11, %v218_v30, %v216_v32  ;;  %vm320_vm11 = vmand %vm303_vm1, %vm244_vm15 }
  0x40   : >> { %vm224_vm12 = vcmp.ge.f32.partialorder %v222_v33, %v220_v35  ;;  %v227_v37 = vrot.slane %v222_v33, 1  ;;  %v228_v38 = vrot.slane %v223_v34, 1 }
  0x41   : >> { %v225_v39 = vsel %vm224_vm12, %v222_v33, %v220_v35  ;;  %v226_v40 = vsel %vm224_vm12, %v223_v34, %v221_v36 }
  0x42   : >> { %vm229_vm13 = vcmp.ge.f32.partialorder %v227_v37, %v225_v39  ;;  %v232_v41 = vrot.slane %v227_v37, 1  ;;  %v233_v42 = vrot.slane %v228_v38, 1 }
  0x43   : >> { %v230_v43 = vsel %vm229_vm13, %v227_v37, %v225_v39  ;;  %v231_v44 = vsel %vm229_vm13, %v228_v38, %v226_v40  ;;  %vm292_vm13 = vmand %vm275_vm2, %vm244_vm15 }
  0x44   : >> { %vm234_vm14 = vcmp.ge.f32.partialorder %v232_v41, %v230_v43 }
  0x45   : >> { %v236_v45 = vsel %vm234_vm14, %v233_v42, %v231_v44  ;;  %vm267_vm14 = vcmp.gt.s32.totalorder %v885_v47, %v873_v13 }
  0x46   : >> { %238 = vrot.lane.b32.xlu0 %v236_v45, %s237_s30  ;;  %s616_s30 = sshll.u32 (%p171_p12), %s805_s16, 4 }
  0xb8   : >> { %v239_v46 = vpop.permute.xlu0 %238 }
  0xb9   : >> { %621 = vpush %v239_v46 }
  0xea   : >> { %s622_s5 = spop %621 }
  0xeb   : >> { %v245_v50 = vstv %s622_s5  ;;  %s250_s6 = scalar_lea.vmem %s849_s11, %s622_s5 [#allocation1]  ;;  %s256_s10 = scalar_lea.vmem [#allocation7], %s622_s5 }
  0xec   : >> { %v247_v51 = vsel %vm244_vm15, %v245_v50, %v246_v48  ;;  %v252_v52 = vld [vmem:[%s250_s6] ss:$0 sm:$0xff] }
  0xed   : >> { %248 = vst [vmem:[%s854_s19] sm:$0x1] %v247_v51  ;;  %v258_v54 = vld [vmem:[%s256_s10] ss:$0 sm:$0xff]  ;;  %vm261_vm0 = vcmp.ne.f32.partialorder %v252_v52, 0.0  ;;  %v268_v11 = vsel %vm267_vm14, %v252_v52, 0.0  ;;  %s432_s19 = sshll.u32 (%p171_p12), %s134_s20, 4  ;;  %s433_s19 = int_to_ptr.vmem [resolvable:$true] %s432_s19 }
  0xee   : >> { %253 = vst [vmem:[%s250_s6] sm:$0x1] %v251_v49  ;;  %vm262_vm3 = vmand %vm244_vm15, %vm261_vm0 }
  0xef   : >> { %254 = vst [vmem:[%s249_s4] sm:$0x1] %v252_v52  ;;  %v263_v55 = vsel %vm262_vm3, %v252_v52, 1.0  ;;  %s434_s4 = sshll.u32 (%p171_p12), %s430_s29, 4  ;;  %s703_s29 = scalar_lea.hbm (%p171_p12), %s992_s2, 2  ;;  %s435_s4 = int_to_ptr.hbm [resolvable:$true] %s434_s4 }
  0xf0   : >> { %259 = vst [vmem:[%s256_s10] sm:$0x1] %v257_v53  ;;  %v304_v56 = vsel %vm303_vm1, %v263_v55, 1.0  ;;  %v276_v57 = vsel %vm275_vm2, %v263_v55, 1.0  ;;  %s394_s10 = scalar_lea.sflag (%p171_p12), [#allocation4], %s132_s7  ;;  %s697_s17 = sshra.s32 (%p171_p12), %s435_s4, 4  ;;  %s698_s17 = int_to_ptr.hbm [resolvable:$true] %s697_s17 }
  0xf1   : >> { %260 = vst [vmem:[%s255_s8] sm:$0x1] %v258_v54  ;;  %679 = vrcp.f32 %v304_v56  ;;  %v316_v63 = vand.u32 2147483648, %v304_v56  ;;  %v314_v4 = vand.u32 2147483647, %v304_v56  ;;  %v288_v5 = vand.u32 2147483648, %v276_v57  ;;  %s403_s8 = scalar_lea.vmem (%p171_p12), %s991_s1, %s616_s30  ;;  %s699_s16 = scalar_lea.hbm (%p171_p12), %s698_s17, 2 }
  0xf2   : >> { %681 = vrcp.f32 %v276_v57  ;;  %v286_v7 = vand.u32 2147483647, %v276_v57  ;;  %vm310_vm6 = vweird.f32 %v304_v56  ;;  %vm282_vm8 = vweird.f32 %v276_v57  ;;  %p700_p13 = scmp.ne.s32.totalorder (%p171_p12), %s698_s17, %s699_s16  ;;  %p704_p2 = scmp.lt.s32.totalorder (%p171_p12), %s698_s17, %s992_s2 }
  0xf3   : >> { %v317_v9 = vor.u32 1.1754944e-38, %v316_v63  ;;  %vm315_vm9 = vcmp.eq.f32.partialorder %v314_v4, 8.507059e+37  ;;  %v289_v14 = vor.u32 1.1754944e-38, %v288_v5  ;;  %p705_p3 = scmp.lt.s32.totalorder (%p171_p12), %s703_s29, %s699_s16 }
  0xf4   : >> { %vm287_vm12 = vcmp.eq.f32.partialorder %v286_v7, 8.507059e+37  ;;  %v379_v2 = vld [vmem:[#allocation2] sm:$0x3] (%p171_p12)  ;;  %p701_p0 = pnand (%p171_p12), %p700_p13, %p822_p5 }
  0xf5   : > { %382 = vst [vmem:[%s134_s20] sm:$0x3] (%p171_p12), %v379_v2  ;;  %p706_p4 = por (%p171_p12), %p705_p3, %p704_p2 }
  0xf6   : >> { %v611_v15 = vld [vmem:[%s849_s11 + $0x8] sm:$0xff]  ;;  %v272_v19 = vld [vmem:[%s849_s11] sm:$0xff]  ;;  %p702_p1 = pneg (%p171_p12), %p701_p0 }
  0xf7   : >> { %v680_v58 = vpop.eup %679 }
  0xf8   : >> { %v682_v59 = vpop.eup %681  ;;  %v306_v60 = vmul.f32 %v680_v58, %v304_v56  ;;  %vm311_vm4 = vweird.f32 %v680_v58  ;;  %v327_v30 = vld [vmem:[#allocation7] sm:$0xff] (%p171_p12)  ;;  %v329_v13 = vld [vmem:[#allocation7 + $0x8] sm:$0xff] (%p171_p12)  ;;  %p707_p8 = pnand (%p171_p12), %p706_p4, %p702_p1 }
  0xf9   : >> { %v278_v61 = vmul.f32 %v682_v59, %v276_v57  ;;  %vm283_vm5 = vweird.f32 %v682_v59  ;;  %vm312_vm7 = vmor %vm310_vm6, %vm311_vm4 }
  0xfa   : >> { %v307_v62 = vsub.f32 1.0, %v306_v60  ;;  %vm284_vm10 = vmor %vm282_vm8, %vm283_vm5 }
  0xfb   : >> { %v279_v0 = vsub.f32 1.0, %v278_v61 }
  0xfc   : >> { %v308_v1 = vmul.f32 %v680_v58, %v307_v62 }
  0xfd   : >> { %v280_v6 = vmul.f32 %v682_v59, %v279_v0 }
  0xfe   : >> { %v309_v8 = vadd.f32 %v680_v58, %v308_v1 }
  0xff   : >> { %v281_v10 = vadd.f32 %v682_v59, %v280_v6 }
 0x100   : >> { %v313_v12 = vsel %vm312_vm7, %v680_v58, %v309_v8 }
 0x101   : >> { %v318_v16 = vsel %vm315_vm9, %v317_v9, %v313_v12  ;;  %v285_v17 = vsel %vm284_vm10, %v682_v59, %v281_v10 }
 0x102   : >> { %v319_v18 = vmul.f32 %v611_v15, %v318_v16  ;;  %v290_v20 = vsel %vm287_vm12, %v289_v14, %v285_v17 }
 0x103   : >> { %v291_v21 = vmul.f32 %v290_v20, %v272_v19 }
 0x104   : >> { %v321_v22 = vsel %vm320_vm11, %v319_v18, 0.0 }
 0x105   : >> { %322 = vadd.xlane.f32.xlu1 %v321_v22  ;;  %v293_v23 = vsel %vm292_vm13, %v291_v21, 0.0 }
 0x106   : >> { %294 = vadd.xlane.f32.xlu0 %v293_v23 }
 0x12f   : > { %344 = vxpose.xlu0.b32.start [1/2] (short) (narrow) (%p171_p12), %v327_v30, 8 }
 0x137   : > { %345 = vxpose.xlu0.b32.end [2/2] (short) (narrow) (%p171_p12), %v329_v13, 8 }
 0x178   : >> { %v323_v24 = vpop.xlane.xlu1 %322 }
 0x179   : >> { %v324_v25 = vmul.f32 %v323_v24, %v268_v11  ;;  %v295_v26 = vpop.xlane.xlu0 %294 }
 0x17a   : >> { %v296_v27 = vmul.f32 %v295_v26, %v268_v11  ;;  %173 = sbr.rel (!%p171_p12) target bundleno = 45 (0x2d), region = 202 }
 0x17b   : >> { %v325_v28 = vsub.f32 %v319_v18, %v324_v25 }
 0x17c   : >> { %v297_v29 = vsub.f32 %v291_v21, %v296_v27 }
 0x17d   : >> { %612 = vst [vmem:[%s849_s11 + $0x8] sm:$0xff] %v325_v28 }
 0x17e   : >> { %298 = vst [vmem:[%s849_s11] sm:$0xff] %v297_v29 }
 0x184   : > { %v418_v31 = vld [vmem:[%s849_s11 + $0x8] sm:$0xff] }
 0x185   : > { %v416_v3 = vld [vmem:[%s849_s11] sm:$0xff] }
 0x186   : > { %417 = vst [vmem:[%s403_s8] sm:$0xff] %v416_v3 }
 0x187   : > { %710 = shalt.err (!%p707_p8)
}
 0x188   : > { %623 = dma.vmem_to_hbm [thread:$0]  (%p822_p5), %s433_s19, 32, %s435_s4, %s394_s10   ;;  %419 = vst [vmem:[%s403_s8 + $0x8] sm:$0xff] %v418_v31 }
 0x189   : > { %s443_s20 = scalar_lea.vmem (%p822_p5), %s993_s3, %s933_s26 }
 0x1d3   : > { %v360_v32 = vpop.trf.xlu0 }
 0x1d4   : > { %376 = vst [vmem:[%s859_s22] sm:$0x1] %v360_v32 }
 0x1d8   : > { %440 = sbr.rel (!%p822_p5) target bundleno = 485 (0x1e5), region = 80 }
 0x1db   : > { %v385_v33 = vld [vmem:[#allocation5] sm:$0x3] }
 0x1dc   : > { %388 = vst [vmem:[%s140_s21] sm:$0x3] %v385_v33 }
 0x1e3   : > { %v460_v34 = vld [vmem:[%s140_s21] sm:$0x3] }
 0x1e4   : > { %461 = vst [vmem:[%s443_s20] sm:$0x3] %v460_v34 }
 0x1e5 PF: > { %s489_s22 = sand.u32 1, %s741_s12   ;;  %p626_p9 = pnand %p597_p7, %p826_p6 }
 0x1e6   : > { %s490_s24 = scalar_lea.sflag [#allocation4], %s489_s22 }
 0x1e7   : > { %p627_p10 = pneg %p626_p9 }
 0x1e9   : > { %736 = dma.done.wait (%p627_p10), %s490_s24, 32  }
 0x1ea   : > { %738 = vsyncadd (%p627_p10), %s490_s24, 4294967264  ;;  %p10_p5 = scmp.ge.s32.totalorder %s809_s18, 4   ;;  %s996_s12 = smov %s745_s13 }
 0x1eb   : > { %s997_s13 = smov %s749_s14  ;;  %s998_s14 = smov %s820_s23 }
 0x1ec   : > { %s999_s15 = smov %s809_s18  ;;  %12 = sbr.rel (!%p10_p5) target bundleno = 3 (0x3), region = 213 }
 0x1f1   :  { %503 = vsyncpa [#allocation4], 1 }
 0x1f2   :  { %505 = vsyncpa [#allocation4 + $0x1], 1 }

// kernel: custom-call.10
= control target key start
LH: loop header
LB: loop body
LE: loop exit
PB: predicated region body
PF: predicated region fallthrough
CT: control target
= control target key end

     0   :  { %s550_s6 = smov 0   ;;  %s552_s7 = smov 0   ;;  %s649_s0 = inlined_call_operand.vmem [shape: f32[2,1,12,12], index: 0, kind: input, shape index: {}]   ;;  %s650_s1 = inlined_call_operand.vmem [shape: f32[2,1,12,12], index: 1, kind: output, shape index: {}]  }
   0x1   :  { %s554_s8 = smov 0  }
   0x2 LB: > { %s466_s9 = sadd.s32 4294967295, %s536_s8   ;;  %s33_s10 = sadd.s32 1, %s532_s7  ;;  %s536_s8 = sphi %s554_s8, %s7_s8   ;;  %s532_s7 = sphi %s552_s7, %s652_s7   ;;  %s528_s6 = sphi %s550_s6, %s651_s6  }
   0x3   : > { %p35_p0 = scmp.ge.s32.totalorder %s33_s10, 2  ;;  %p468_p1 = scmp.ge.s32.totalorder %s536_s8, 2 }
   0x4   : > { %s49_s11 = sand.u32 (!%p468_p1), 1, %s536_s8   ;;  %s482_s12 = sshll.u32 (!%p468_p1), %s532_s7, 4 }
   0x5   : > { %s654_s10 = smov (%p35_p0, %s33_s10), 0  ;;  %47 = sbr.rel (%p468_p1) target bundleno = 13 (0xd), region = 16 }
   0x6   : > { %s469_s13 = sshll.u32 (!%p468_p1), %s49_s11, 4  ;;  %s58_s16 = scalar_lea.vmem (!%p468_p1), %s649_s0, %s482_s12 }
   0x7   : > { %s51_s17 = scalar_lea.vmem (!%p468_p1), [#allocation0], %s469_s13 }
   0xa   : > { %v89_v0 = vld [vmem:[%s58_s16] sm:$0xff]  ;;  %v91_v1 = vld [vmem:[%s58_s16 + $0x8] sm:$0xff] }
   0xb   : > { %90 = vst [vmem:[%s51_s17] sm:$0xff] %v89_v0 }
   0xc   : > { %92 = vst [vmem:[%s51_s17 + $0x8] sm:$0xff] %v91_v1 }
   0xd PF: > { %p472_p2 = scmp.ge.s32.totalorder %s536_s8, 1  ;;  %p97_p3 = scmp.lt.s32.totalorder %s536_s8, 3 }
   0xf   : > { %p98_p4 = pnand %p472_p2, %p97_p3 }
  0x11   : > { %101 = sbr.rel (%p98_p4) target bundleno = 1486 (0x5ce), region = 54 }
  0x16   : > { %s104_s18 = sand.u32 1, %s466_s9   ;;  %v115_v2 = vlaneseq  ;;  %v538_v20 = vmov -1.0   ;;  %v539_v63 = vmov 0.0   ;;  %s483_s21 = sshll.u32 %s528_s6, 4 }
  0x17   : > { %s473_s19 = sshll.u32 %s104_s18, 4  ;;  %s365_s24 = scalar_lea.vmem %s650_s1, %s483_s21 }
  0x18   : > { %v577_v3 = vand.u32 127, %v115_v2  ;;  %v119_v4 = vshrl.u32 %v115_v2, 7  ;;  %s579_s20 = scalar_lea.vmem [#allocation0], %s473_s19 }
  0x19   : > { %v122_v5 = vld [vmem:[%s579_s20] sm:$0xff]  ;;  %v475_v42 = vld [vmem:[%s579_s20 + $0x8] sm:$0xff] }
  0x1a   : > { %vm121_vm0 = vcmp.eq.s32.totalorder %v119_v4, %v577_v3  ;;  %vm117_vm1 = vcmp.lt.s32.totalorder %v577_v3, 12  ;;  %vm126_vm2 = vcmp.ge.s32.totalorder %v119_v4, %v577_v3  ;;  %vm182_vm8 = vcmp.eq.s32.totalorder %v577_v3, 0 }
  0x1b   : > { %v123_v6 = vsel %vm121_vm0, %v122_v5, 0.0  ;;  %vm127_vm3 = vmand %vm126_vm2, %vm117_vm1  ;;  %vm179_vm9 = vcmp.eq.s32.totalorder %v577_v3, %v119_v4  ;;  %v183_v21 = vsel %vm182_vm8, 1.0, %v538_v20  ;;  %vm197_vm10 = vcmp.eq.s32.totalorder %v577_v3, 1 }
  0x1c   : > { %124 = vadd.xlane.f32.xlu0 %v123_v6  ;;  %v128_v15 = vsel %vm127_vm3, %v122_v5, 0.0  ;;  %v184_v22 = vsel %vm179_vm9, %v183_v21, 0.0  ;;  %vm207_vm11 = vcmp.eq.s32.totalorder %v577_v3, 2  ;;  %vm217_vm12 = vcmp.eq.s32.totalorder %v577_v3, 3 }
  0x1d   : > { %v149_v41 = vadd.s32 8, %v119_v4  ;;  %vm227_vm14 = vcmp.eq.s32.totalorder %v577_v3, 4  ;;  %vm237_vm8 = vcmp.eq.s32.totalorder %v577_v3, 5  ;;  %vm257_vm9 = vcmp.eq.s32.totalorder %v577_v3, 7 }
  0x1f   : > { %vm150_vm13 = vcmp.eq.s32.totalorder %v149_v41, %v577_v3  ;;  %vm155_vm15 = vcmp.ge.s32.totalorder %v149_v41, %v577_v3 }
  0x20   : > { %v152_v43 = vsel %vm150_vm13, %v475_v42, 0.0  ;;  %vm156_vm3 = vmand %vm155_vm15, %vm117_vm1  ;;  %vm247_vm1 = vcmp.eq.s32.totalorder %v577_v3, 6  ;;  %vm309_vm13 = vcmp.eq.s32.totalorder %v577_v3, 11 }
  0x21   : > { %v157_v58 = vsel %vm156_vm3, %v475_v42, 0.0 }
  0x8f   : > { %v583_v7 = vpop.xlane.xlu0 %124 }
  0x90   : > { %510 = vrcp.f32 %v583_v7  ;;  %v140_v11 = vand.u32 2147483648, %v583_v7  ;;  %v138_v13 = vand.u32 2147483647, %v583_v7  ;;  %vm134_vm5 = vweird.f32 %v583_v7 }
  0x92   : > { %v141_v16 = vor.u32 1.1754944e-38, %v140_v11  ;;  %vm139_vm7 = vcmp.eq.f32.partialorder %v138_v13, 8.507059e+37 }
  0x96   : > { %v511_v8 = vpop.eup %510 }
  0x97   : > { %v130_v9 = vmul.f32 %v511_v8, %v583_v7  ;;  %vm135_vm4 = vweird.f32 %v511_v8 }
  0x98   : > { %vm136_vm6 = vmor %vm134_vm5, %vm135_vm4 }
  0x99   : > { %v131_v10 = vsub.f32 1.0, %v130_v9 }
  0x9b   : > { %v132_v12 = vmul.f32 %v511_v8, %v131_v10 }
  0x9d   : > { %v133_v14 = vadd.f32 %v511_v8, %v132_v12 }
  0x9f   : > { %v137_v17 = vsel %vm136_vm6, %v511_v8, %v133_v14 }
  0xa0   : > { %v596_v18 = vsel %vm139_vm7, %v141_v16, %v137_v17  ;;  %vm190_vm7 = vcmp.eq.s32.totalorder %v577_v3, %v149_v41 }
  0xa1   : > { %v143_v19 = vmul.f32 %v596_v18, %v128_v15  ;;  %v191_v0 = vsel %vm190_vm7, -1.0, %v539_v63 }
  0xa3   : > { %144 = vst [vmem:[#allocation2] sm:$0xff] %v143_v19 }
  0xaa   : > { %v193_v23 = vld [vmem:[#allocation2 + $0x1] ss:$0 sm:$0xff]  ;;  %v203_v26 = vld [vmem:[#allocation2 + $0x2] ss:$0 sm:$0xff]  ;;  %v213_v31 = vld [vmem:[#allocation2 + $0x3] ss:$0 sm:$0xff] }
  0xab   : > { %v194_v24 = vxor.u32 2147483648, %v193_v23  ;;  %v204_v28 = vxor.u32 2147483648, %v203_v26  ;;  %v214_v33 = vxor.u32 2147483648, %v213_v31  ;;  %v223_v36 = vld [vmem:[#allocation2 + $0x4] ss:$0 sm:$0xff] }
  0xac   : > { %v224_v38 = vxor.u32 2147483648, %v223_v36  ;;  %v233_v44 = vld [vmem:[#allocation2 + $0x5] ss:$0 sm:$0xff]  ;;  %v243_v62 = vld [vmem:[#allocation2 + $0x6] ss:$0 sm:$0xff] }
  0xad   : > { %v198_v25 = vmul.f32 %v194_v24, %v184_v22  ;;  %v234_v46 = vxor.u32 2147483648, %v233_v44  ;;  %v244_v4 = vxor.u32 2147483648, %v243_v62  ;;  %v253_v10 = vld [vmem:[#allocation2 + $0x7] ss:$0 sm:$0xff] }
  0xae   : > { %v254_v12 = vxor.u32 2147483648, %v253_v10 }
  0xaf   : > { %199 = vadd.xlane.f32.xlu0 %v198_v25 }
 0x122   : > { %v200_v27 = vpop.xlane.xlu0 %199 }
 0x123   : > { %v201_v29 = vsel %vm197_vm10, %v200_v27, %v184_v22  ;;  %vm267_vm10 = vcmp.eq.s32.totalorder %v577_v3, 8 }
 0x124   : > { %v208_v30 = vmul.f32 %v204_v28, %v201_v29 }
 0x126   : > { %209 = vadd.xlane.f32.xlu1 %v208_v30 }
 0x199   : > { %v210_v32 = vpop.xlane.xlu1 %209 }
 0x19a   : > { %v211_v34 = vsel %vm207_vm11, %v210_v32, %v201_v29  ;;  %vm281_vm11 = vcmp.eq.s32.totalorder %v577_v3, 9 }
 0x19b   : > { %v218_v35 = vmul.f32 %v214_v33, %v211_v34 }
 0x19d   : > { %219 = vadd.xlane.f32.xlu1 %v218_v35 }
 0x1a5   : > { %153 = vadd.xlane.f32.xlu1 %v152_v43 }
 0x210   : > { %v220_v37 = vpop.xlane.xlu1 %219 }
 0x211   : > { %v221_v39 = vsel %vm217_vm12, %v220_v37, %v211_v34  ;;  %vm295_vm12 = vcmp.eq.s32.totalorder %v577_v3, 10 }
 0x212   : > { %v228_v40 = vmul.f32 %v224_v38, %v221_v39 }
 0x214   : > { %229 = vadd.xlane.f32.xlu2 %v228_v40 }
 0x218   : > { %v607_v49 = vpop.xlane.xlu1 %153 }
 0x219   : > { %512 = vrcp.f32 %v607_v49  ;;  %v169_v52 = vand.u32 2147483648, %v607_v49  ;;  %vm163_vm0 = vweird.f32 %v607_v49  ;;  %v167_v54 = vand.u32 2147483647, %v607_v49 }
 0x21b   : > { %v170_v56 = vor.u32 1.1754944e-38, %v169_v52  ;;  %vm168_vm6 = vcmp.eq.f32.partialorder %v167_v54, 8.507059e+37 }
 0x21f   : > { %v513_v50 = vpop.eup %512 }
 0x220   : > { %v159_v51 = vmul.f32 %v513_v50, %v607_v49  ;;  %vm164_vm2 = vweird.f32 %v513_v50 }
 0x221   : > { %vm165_vm4 = vmor %vm163_vm0, %vm164_vm2 }
 0x222   : > { %v160_v53 = vsub.f32 1.0, %v159_v51 }
 0x224   : > { %v161_v55 = vmul.f32 %v513_v50, %v160_v53 }
 0x226   : > { %v162_v57 = vadd.f32 %v513_v50, %v161_v55 }
 0x228   : > { %v166_v59 = vsel %vm165_vm4, %v513_v50, %v162_v57 }
 0x229   : > { %v619_v60 = vsel %vm168_vm6, %v170_v56, %v166_v59 }
 0x22a   : > { %v172_v61 = vmul.f32 %v619_v60, %v157_v58 }
 0x22c   : > { %173 = vst [vmem:[#allocation2 + $0x8] sm:$0xff] %v172_v61 }
 0x233   : > { %v263_v1 = vld [vmem:[#allocation2 + $0x8] ss:$0 sm:$0xff]  ;;  %v277_v19 = vld [vmem:[#allocation2 + $0x9] ss:$0 sm:$0xff]  ;;  %v291_v27 = vld [vmem:[#allocation2 + $0xa] ss:$0 sm:$0xff] }
 0x234   : > { %v264_v5 = vxor.u32 2147483648, %v263_v1  ;;  %v278_v21 = vxor.u32 2147483648, %v277_v19  ;;  %v292_v29 = vxor.u32 2147483648, %v291_v27  ;;  %v305_v35 = vld [vmem:[#allocation2 + $0xb] ss:$0 sm:$0xff] }
 0x235   : > { %v306_v37 = vxor.u32 2147483648, %v305_v35 }
 0x236   : > { %v272_v9 = vmul.f32 %v264_v5, %v191_v0 }
 0x238   : > { %273 = vadd.xlane.f32.xlu1 %v272_v9 }
 0x287   : > { %v230_v45 = vpop.xlane.xlu2 %229 }
 0x288   : > { %v231_v47 = vsel %vm227_vm14, %v230_v45, %v221_v39 }
 0x289   : > { %v238_v48 = vmul.f32 %v234_v46, %v231_v47 }
 0x28b   : > { %239 = vadd.xlane.f32.xlu2 %v238_v48 }
 0x2ab   : > { %v274_v20 = vpop.xlane.xlu1 %273 }
 0x2ac   : > { %v275_v22 = vsel %vm267_vm10, %v274_v20, %v191_v0 }
 0x2ad   : > { %v286_v23 = vmul.f32 %v278_v21, %v275_v22 }
 0x2fe   : > { %v240_v2 = vpop.xlane.xlu2 %239 }
 0x2ff   : > { %v241_v6 = vsel %vm237_vm8, %v240_v2, %v231_v47 }
 0x300   : > { %v248_v8 = vmul.f32 %v244_v4, %v241_v6 }
 0x302   : > { %249 = vadd.xlane.f32.xlu0 %v248_v8 }
 0x375   : > { %v250_v11 = vpop.xlane.xlu0 %249 }
 0x376   : > { %v251_v13 = vsel %vm247_vm1, %v250_v11, %v241_v6 }
 0x377   : > { %v258_v14 = vmul.f32 %v254_v12, %v251_v13 }
 0x379   : > { %259 = vadd.xlane.f32.xlu2 %v258_v14 }
 0x3ec   : > { %v260_v15 = vpop.xlane.xlu2 %259 }
 0x3ed   : > { %v261_v16 = vsel %vm257_vm9, %v260_v15, %v251_v13 }
 0x3ee   : > { %v268_v17 = vmul.f32 %v264_v5, %v261_v16 }
 0x3f0   : > { %269 = vadd.xlane.f32.xlu0 %v268_v17 }
 0x3f8   : > { %287 = vadd.xlane.f32.xlu0 %v286_v23 }
 0x463   : > { %v270_v24 = vpop.xlane.xlu0 %269 }
 0x464   : > { %v271_v25 = vsel %vm267_vm10, %v270_v24, %v261_v16 }
 0x465   : > { %v282_v26 = vmul.f32 %v278_v21, %v271_v25 }
 0x467   : > { %283 = vadd.xlane.f32.xlu2 %v282_v26 }
 0x46b   : > { %v288_v28 = vpop.xlane.xlu0 %287 }
 0x46c   : > { %v289_v30 = vsel %vm281_vm11, %v288_v28, %v275_v22 }
 0x46d   : > { %v300_v31 = vmul.f32 %v292_v29, %v289_v30 }
 0x46f   : > { %301 = vadd.xlane.f32.xlu2 %v300_v31 }
 0x4da   : > { %v284_v32 = vpop.xlane.xlu2 %283 }
 0x4db   : > { %v285_v33 = vsel %vm281_vm11, %v284_v32, %v271_v25 }
 0x4dc   : > { %v296_v34 = vmul.f32 %v292_v29, %v285_v33 }
 0x4de   : > { %297 = vadd.xlane.f32.xlu1 %v296_v34 }
 0x4e2   : > { %v302_v36 = vpop.xlane.xlu2 %301 }
 0x4e3   : > { %v303_v38 = vsel %vm295_vm12, %v302_v36, %v289_v30 }
 0x4e4   : > { %v314_v39 = vmul.f32 %v306_v37, %v303_v38 }
 0x4e6   : > { %315 = vadd.xlane.f32.xlu1 %v314_v39 }
 0x551   : > { %v298_v40 = vpop.xlane.xlu1 %297 }
 0x552   : > { %v299_v41 = vsel %vm295_vm12, %v298_v40, %v285_v33 }
 0x553   : > { %v310_v42 = vmul.f32 %v306_v37, %v299_v41 }
 0x555   : > { %311 = vadd.xlane.f32.xlu0 %v310_v42 }
 0x559   : > { %v316_v43 = vpop.xlane.xlu1 %315 }
 0x55a   : > { %v317_v44 = vsel %vm309_vm13, %v316_v43, %v303_v38 }
 0x55b   : > { %v350_v45 = vmul.f32 %v317_v44, %v619_v60 }
 0x55d   : > { %v352_v46 = vsel %vm163_vm0, %v317_v44, %v350_v45 }
 0x55e   : > { %399 = vst [vmem:[%s365_s24 + $0x8] sm:$0xff] %v352_v46 }
 0x5c8   : > { %v312_v47 = vpop.xlane.xlu0 %311 }
 0x5c9   : > { %v313_v48 = vsel %vm309_vm13, %v312_v47, %v299_v41 }
 0x5ca   : > { %v332_v50 = vmul.f32 %v313_v48, %v596_v18 }
 0x5cc   : > { %v334_v3 = vsel %vm134_vm5, %v313_v48, %v332_v50 }
 0x5cd   : > { %397 = vst [vmem:[%s365_s24] sm:$0xff] %v334_v3 }
 0x5ce PF: > { %s7_s8 = sadd.s32 1, %s536_s8   ;;  %s651_s6 = smov %s532_s7 }
 0x5cf   : > { %p4_p5 = scmp.ge.s32.totalorder %s7_s8, 4   ;;  %s652_s7 = smov %s654_s10 }
 0x5d1   :  { %6 = sbr.rel (!%p4_p5) target bundleno = 2 (0x2), region = 132 }

// kernel: custom-call.9
= control target key start
LH: loop header
LB: loop body
LE: loop exit
PB: predicated region body
PF: predicated region fallthrough
CT: control target
= control target key end

     0   :  { %s565_s6 = smov 0   ;;  %s567_s7 = smov 0   ;;  %s670_s0 = inlined_call_operand.vmem [shape: f32[2,1,12,12], index: 0, kind: input, shape index: {}]   ;;  %s671_s1 = inlined_call_operand.vmem [shape: f32[2,1,12,12], index: 1, kind: output, shape index: {}]  }
   0x1   :  { %s569_s8 = smov 0  }
   0x2 LB: > { %s481_s9 = sadd.s32 4294967295, %s551_s8   ;;  %s33_s10 = sadd.s32 1, %s547_s7  ;;  %s551_s8 = sphi %s569_s8, %s7_s8   ;;  %s547_s7 = sphi %s567_s7, %s673_s7   ;;  %s543_s6 = sphi %s565_s6, %s672_s6  }
   0x3   : > { %p35_p0 = scmp.ge.s32.totalorder %s33_s10, 2  ;;  %p483_p1 = scmp.ge.s32.totalorder %s551_s8, 2 }
   0x4   : > { %s49_s11 = sand.u32 (!%p483_p1), 1, %s551_s8   ;;  %s497_s12 = sshll.u32 (!%p483_p1), %s547_s7, 4 }
   0x5   : > { %s675_s10 = smov (%p35_p0, %s33_s10), 0  ;;  %47 = sbr.rel (%p483_p1) target bundleno = 13 (0xd), region = 16 }
   0x6   : > { %s484_s13 = sshll.u32 (!%p483_p1), %s49_s11, 4  ;;  %s58_s16 = scalar_lea.vmem (!%p483_p1), %s670_s0, %s497_s12 }
   0x7   : > { %s51_s17 = scalar_lea.vmem (!%p483_p1), [#allocation0], %s484_s13 }
   0xa   : > { %v89_v0 = vld [vmem:[%s58_s16] sm:$0xff]  ;;  %v91_v1 = vld [vmem:[%s58_s16 + $0x8] sm:$0xff] }
   0xb   : > { %90 = vst [vmem:[%s51_s17] sm:$0xff] %v89_v0 }
   0xc   : > { %92 = vst [vmem:[%s51_s17 + $0x8] sm:$0xff] %v91_v1 }
   0xd PF: > { %p487_p2 = scmp.ge.s32.totalorder %s551_s8, 1  ;;  %p97_p3 = scmp.lt.s32.totalorder %s551_s8, 3 }
   0xf   : > { %p98_p4 = pnand %p487_p2, %p97_p3 }
  0x11   : > { %101 = sbr.rel (%p98_p4) target bundleno = 1488 (0x5d0), region = 54 }
  0x16   : > { %s104_s18 = sand.u32 1, %s481_s9   ;;  %v115_v2 = vlaneseq  ;;  %v553_v21 = vmov -1.0   ;;  %v554_v52 = vmov 0.0   ;;  %s498_s21 = sshll.u32 %s543_s6, 4 }
  0x17   : > { %s488_s19 = sshll.u32 %s104_s18, 4  ;;  %s380_s24 = scalar_lea.vmem %s671_s1, %s498_s21 }
  0x18   : > { %v592_v3 = vand.u32 127, %v115_v2  ;;  %v594_v4 = vshrl.u32 %v115_v2, 7  ;;  %s597_s20 = scalar_lea.vmem [#allocation0], %s488_s19 }
  0x19   : > { %v490_v6 = vld [vmem:[%s597_s20 + $0x8] sm:$0xff]  ;;  %v122_v32 = vld [vmem:[%s597_s20] sm:$0xff] }
  0x1a   : > { %v149_v5 = vadd.s32 8, %v594_v4  ;;  %vm117_vm1 = vcmp.lt.s32.totalorder %v592_v3, 12  ;;  %vm189_vm8 = vcmp.eq.s32.totalorder %v592_v3, 11  ;;  %vm197_vm10 = vcmp.eq.s32.totalorder %v592_v3, 10 }
  0x1b   : > { %v190_v22 = vsel %vm189_vm8, 1.0, %v553_v21  ;;  %vm121_vm11 = vcmp.eq.s32.totalorder %v594_v4, %v592_v3  ;;  %vm207_vm12 = vcmp.eq.s32.totalorder %v592_v3, 9  ;;  %vm126_vm13 = vcmp.le.s32.totalorder %v594_v4, %v592_v3 }
  0x1c   : > { %vm150_vm0 = vcmp.eq.s32.totalorder %v149_v5, %v592_v3  ;;  %vm155_vm2 = vcmp.le.s32.totalorder %v149_v5, %v592_v3  ;;  %vm186_vm9 = vcmp.eq.s32.totalorder %v592_v3, %v149_v5  ;;  %v123_v33 = vsel %vm121_vm11, %v122_v32, 0.0 }
  0x1d   : > { %v152_v7 = vsel %vm150_vm0, %v490_v6, 0.0  ;;  %vm156_vm3 = vmand %vm155_vm2, %vm117_vm1  ;;  %v191_v23 = vsel %vm186_vm9, %v190_v22, 0.0  ;;  %vm255_vm8 = vcmp.eq.s32.totalorder %v592_v3, 5  ;;  %vm269_vm9 = vcmp.eq.s32.totalorder %v592_v3, 4 }
  0x1e   : > { %153 = vadd.xlane.f32.xlu0 %v152_v7  ;;  %v157_v16 = vsel %vm156_vm3, %v490_v6, 0.0  ;;  %vm127_vm0 = vmand %vm126_vm13, %vm117_vm1  ;;  %vm217_vm1 = vcmp.eq.s32.totalorder %v592_v3, 8  ;;  %vm297_vm11 = vcmp.eq.s32.totalorder %v592_v3, 2  ;;  %vm324_vm13 = vcmp.eq.s32.totalorder %v592_v3, 0 }
  0x1f   : > { %v128_v48 = vsel %vm127_vm0, %v122_v32, 0.0 }
  0x91   : > { %v601_v8 = vpop.xlane.xlu0 %153 }
  0x92   : > { %525 = vrcp.f32 %v601_v8  ;;  %v169_v12 = vand.u32 2147483648, %v601_v8  ;;  %v167_v14 = vand.u32 2147483647, %v601_v8  ;;  %vm163_vm5 = vweird.f32 %v601_v8 }
  0x94   : > { %v170_v17 = vor.u32 1.1754944e-38, %v169_v12  ;;  %vm168_vm7 = vcmp.eq.f32.partialorder %v167_v14, 8.507059e+37 }
  0x98   : > { %v526_v9 = vpop.eup %525 }
  0x99   : > { %v159_v10 = vmul.f32 %v526_v9, %v601_v8  ;;  %vm164_vm4 = vweird.f32 %v526_v9 }
  0x9a   : > { %vm165_vm6 = vmor %vm163_vm5, %vm164_vm4  ;;  %vm179_vm4 = vcmp.eq.s32.totalorder %v592_v3, %v594_v4 }
  0x9b   : > { %v160_v11 = vsub.f32 1.0, %v159_v10  ;;  %v180_v53 = vsel %vm179_vm4, -1.0, %v554_v52 }
  0x9d   : > { %v161_v13 = vmul.f32 %v526_v9, %v160_v11 }
  0x9f   : > { %v162_v15 = vadd.f32 %v526_v9, %v161_v13 }
  0xa1   : > { %v166_v18 = vsel %vm165_vm6, %v526_v9, %v162_v15  ;;  %vm227_vm6 = vcmp.eq.s32.totalorder %v592_v3, 7 }
  0xa2   : > { %v614_v19 = vsel %vm168_vm7, %v170_v17, %v166_v18  ;;  %vm241_vm7 = vcmp.eq.s32.totalorder %v592_v3, 6 }
  0xa3   : > { %v172_v20 = vmul.f32 %v614_v19, %v157_v16 }
  0xa5   : > { %173 = vst [vmem:[#allocation2 + $0x8] sm:$0xff] %v172_v20 }
  0xac   : > { %v193_v24 = vld [vmem:[#allocation2 + $0xa] ss:$0 sm:$0xff]  ;;  %v203_v27 = vld [vmem:[#allocation2 + $0x9] ss:$0 sm:$0xff]  ;;  %v213_v34 = vld [vmem:[#allocation2 + $0x8] ss:$0 sm:$0xff] }
  0xad   : > { %v194_v25 = vxor.u32 2147483648, %v193_v24  ;;  %v204_v29 = vxor.u32 2147483648, %v203_v27  ;;  %v214_v36 = vxor.u32 2147483648, %v213_v34 }
  0xaf   : > { %v198_v26 = vmul.f32 %v194_v25, %v191_v23 }
  0xb1   : > { %199 = vadd.xlane.f32.xlu0 %v198_v26 }
 0x124   : > { %v200_v28 = vpop.xlane.xlu0 %199 }
 0x125   : > { %v201_v30 = vsel %vm197_vm10, %v200_v28, %v191_v23  ;;  %vm283_vm10 = vcmp.eq.s32.totalorder %v592_v3, 3 }
 0x126   : > { %v208_v31 = vmul.f32 %v204_v29, %v201_v30 }
 0x128   : > { %209 = vadd.xlane.f32.xlu1 %v208_v31 }
 0x130   : > { %124 = vadd.xlane.f32.xlu1 %v123_v33 }
 0x19b   : > { %v210_v35 = vpop.xlane.xlu1 %209 }
 0x19c   : > { %v211_v37 = vsel %vm207_vm12, %v210_v35, %v201_v30  ;;  %vm311_vm12 = vcmp.eq.s32.totalorder %v592_v3, 1 }
 0x19d   : > { %v218_v38 = vmul.f32 %v214_v36, %v211_v37 }
 0x19f   : > { %219 = vadd.xlane.f32.xlu2 %v218_v38 }
 0x1a3   : > { %v624_v39 = vpop.xlane.xlu1 %124 }
 0x1a4   : > { %527 = vrcp.f32 %v624_v39  ;;  %v140_v42 = vand.u32 2147483648, %v624_v39  ;;  %vm134_vm14 = vweird.f32 %v624_v39  ;;  %v138_v44 = vand.u32 2147483647, %v624_v39 }
 0x1a6   : > { %v141_v46 = vor.u32 1.1754944e-38, %v140_v42  ;;  %vm139_vm3 = vcmp.eq.f32.partialorder %v138_v44, 8.507059e+37 }
 0x1aa   : > { %v528_v40 = vpop.eup %527 }
 0x1ab   : > { %v130_v41 = vmul.f32 %v528_v40, %v624_v39  ;;  %vm135_vm15 = vweird.f32 %v528_v40 }
 0x1ac   : > { %vm136_vm2 = vmor %vm134_vm14, %vm135_vm15 }
 0x1ad   : > { %v131_v43 = vsub.f32 1.0, %v130_v41 }
 0x1af   : > { %v132_v45 = vmul.f32 %v528_v40, %v131_v43 }
 0x1b1   : > { %v133_v47 = vadd.f32 %v528_v40, %v132_v45 }
 0x1b3   : > { %v137_v49 = vsel %vm136_vm2, %v528_v40, %v133_v47 }
 0x1b4   : > { %v637_v50 = vsel %vm139_vm3, %v141_v46, %v137_v49 }
 0x1b5   : > { %v143_v51 = vmul.f32 %v637_v50, %v128_v48 }
 0x1b7   : > { %144 = vst [vmem:[#allocation2] sm:$0xff] %v143_v51 }
 0x1be   : > { %v223_v54 = vld [vmem:[#allocation2 + $0x7] ss:$0 sm:$0xff]  ;;  %v237_v60 = vld [vmem:[#allocation2 + $0x6] ss:$0 sm:$0xff]  ;;  %v251_v5 = vld [vmem:[#allocation2 + $0x5] ss:$0 sm:$0xff] }
 0x1bf   : > { %v224_v55 = vxor.u32 2147483648, %v223_v54  ;;  %v238_v62 = vxor.u32 2147483648, %v237_v60  ;;  %v252_v7 = vxor.u32 2147483648, %v251_v5  ;;  %v265_v14 = vld [vmem:[#allocation2 + $0x4] ss:$0 sm:$0xff] }
 0x1c0   : > { %v266_v16 = vxor.u32 2147483648, %v265_v14  ;;  %v279_v23 = vld [vmem:[#allocation2 + $0x3] ss:$0 sm:$0xff]  ;;  %v293_v31 = vld [vmem:[#allocation2 + $0x2] ss:$0 sm:$0xff] }
 0x1c1   : > { %v228_v56 = vmul.f32 %v224_v55, %v180_v53  ;;  %v280_v25 = vxor.u32 2147483648, %v279_v23  ;;  %v294_v33 = vxor.u32 2147483648, %v293_v31  ;;  %v307_v40 = vld [vmem:[#allocation2 + $0x1] ss:$0 sm:$0xff]  ;;  %v320_v48 = vld [vmem:[#allocation2] ss:$0 sm:$0xff] }
 0x1c2   : > { %v308_v42 = vxor.u32 2147483648, %v307_v40  ;;  %v321_v51 = vxor.u32 2147483648, %v320_v48 }
 0x1c3   : > { %229 = vadd.xlane.f32.xlu2 %v228_v56 }
 0x212   : > { %v220_v57 = vpop.xlane.xlu2 %219 }
 0x213   : > { %v221_v58 = vsel %vm217_vm1, %v220_v57, %v211_v37 }
 0x214   : > { %v232_v59 = vmul.f32 %v224_v55, %v221_v58 }
 0x216   : > { %233 = vadd.xlane.f32.xlu0 %v232_v59 }
 0x236   : > { %v230_v61 = vpop.xlane.xlu2 %229 }
 0x237   : > { %v231_v63 = vsel %vm227_vm6, %v230_v61, %v180_v53 }
 0x238   : > { %v242_v0 = vmul.f32 %v238_v62, %v231_v63 }
 0x23a   : > { %243 = vadd.xlane.f32.xlu1 %v242_v0 }
 0x289   : > { %v234_v1 = vpop.xlane.xlu0 %233 }
 0x28a   : > { %v235_v2 = vsel %vm227_vm6, %v234_v1, %v221_v58 }
 0x28b   : > { %v246_v4 = vmul.f32 %v238_v62, %v235_v2 }
 0x28d   : > { %247 = vadd.xlane.f32.xlu2 %v246_v4 }
 0x2ad   : > { %v244_v6 = vpop.xlane.xlu1 %243 }
 0x2ae   : > { %v245_v9 = vsel %vm241_vm7, %v244_v6, %v231_v63 }
 0x2af   : > { %v256_v10 = vmul.f32 %v252_v7, %v245_v9 }
 0x2b1   : > { %257 = vadd.xlane.f32.xlu0 %v256_v10 }
 0x300   : > { %v248_v11 = vpop.xlane.xlu2 %247 }
 0x301   : > { %v249_v12 = vsel %vm241_vm7, %v248_v11, %v235_v2 }
 0x302   : > { %v260_v13 = vmul.f32 %v252_v7, %v249_v12 }
 0x304   : > { %261 = vadd.xlane.f32.xlu1 %v260_v13 }
 0x324   : > { %v258_v15 = vpop.xlane.xlu0 %257 }
 0x325   : > { %v259_v17 = vsel %vm255_vm8, %v258_v15, %v245_v9 }
 0x326   : > { %v270_v18 = vmul.f32 %v266_v16, %v259_v17 }
 0x328   : > { %271 = vadd.xlane.f32.xlu2 %v270_v18 }
 0x377   : > { %v262_v20 = vpop.xlane.xlu1 %261 }
 0x378   : > { %v263_v21 = vsel %vm255_vm8, %v262_v20, %v249_v12 }
 0x379   : > { %v274_v22 = vmul.f32 %v266_v16, %v263_v21 }
 0x37b   : > { %275 = vadd.xlane.f32.xlu0 %v274_v22 }
 0x39b   : > { %v272_v24 = vpop.xlane.xlu2 %271 }
 0x39c   : > { %v273_v26 = vsel %vm269_vm9, %v272_v24, %v259_v17 }
 0x39d   : > { %v284_v27 = vmul.f32 %v280_v25, %v273_v26 }
 0x39f   : > { %285 = vadd.xlane.f32.xlu1 %v284_v27 }
 0x3ee   : > { %v276_v28 = vpop.xlane.xlu0 %275 }
 0x3ef   : > { %v277_v29 = vsel %vm269_vm9, %v276_v28, %v263_v21 }
 0x3f0   : > { %v288_v30 = vmul.f32 %v280_v25, %v277_v29 }
 0x3f2   : > { %289 = vadd.xlane.f32.xlu2 %v288_v30 }
 0x412   : > { %v286_v32 = vpop.xlane.xlu1 %285 }
 0x413   : > { %v287_v34 = vsel %vm283_vm10, %v286_v32, %v273_v26 }
 0x414   : > { %v298_v35 = vmul.f32 %v294_v33, %v287_v34 }
 0x416   : > { %299 = vadd.xlane.f32.xlu0 %v298_v35 }
 0x465   : > { %v290_v36 = vpop.xlane.xlu2 %289 }
 0x466   : > { %v291_v37 = vsel %vm283_vm10, %v290_v36, %v277_v29 }
 0x467   : > { %v302_v38 = vmul.f32 %v294_v33, %v291_v37 }
 0x469   : > { %303 = vadd.xlane.f32.xlu1 %v302_v38 }
 0x489   : > { %v300_v41 = vpop.xlane.xlu0 %299 }
 0x48a   : > { %v301_v43 = vsel %vm297_vm11, %v300_v41, %v287_v34 }
 0x48b   : > { %v312_v44 = vmul.f32 %v308_v42, %v301_v43 }
 0x48d   : > { %313 = vadd.xlane.f32.xlu2 %v312_v44 }
 0x4dc   : > { %v304_v45 = vpop.xlane.xlu1 %303 }
 0x4dd   : > { %v305_v46 = vsel %vm297_vm11, %v304_v45, %v291_v37 }
 0x4de   : > { %v316_v47 = vmul.f32 %v308_v42, %v305_v46 }
 0x4e0   : > { %317 = vadd.xlane.f32.xlu0 %v316_v47 }
 0x500   : > { %v314_v49 = vpop.xlane.xlu2 %313 }
 0x501   : > { %v315_v52 = vsel %vm311_vm12, %v314_v49, %v301_v43 }
 0x502   : > { %v325_v53 = vmul.f32 %v321_v51, %v315_v52 }
 0x504   : > { %326 = vadd.xlane.f32.xlu1 %v325_v53 }
 0x553   : > { %v318_v54 = vpop.xlane.xlu0 %317 }
 0x554   : > { %v319_v55 = vsel %vm311_vm12, %v318_v54, %v305_v46 }
 0x555   : > { %v329_v56 = vmul.f32 %v321_v51, %v319_v55 }
 0x557   : > { %330 = vadd.xlane.f32.xlu2 %v329_v56 }
 0x577   : > { %v327_v57 = vpop.xlane.xlu1 %326 }
 0x578   : > { %v328_v58 = vsel %vm324_vm13, %v327_v57, %v315_v52 }
 0x579   : > { %v347_v59 = vmul.f32 %v328_v58, %v637_v50 }
 0x57b   : > { %v349_v60 = vsel %vm134_vm14, %v328_v58, %v347_v59 }
 0x57c   : > { %412 = vst [vmem:[%s380_s24] sm:$0xff] %v349_v60 }
 0x5ca   : > { %v331_v61 = vpop.xlane.xlu2 %330 }
 0x5cb   : > { %v332_v62 = vsel %vm324_vm13, %v331_v61, %v319_v55 }
 0x5cc   : > { %v365_v63 = vmul.f32 %v332_v62, %v614_v19 }
 0x5ce   : > { %v367_v3 = vsel %vm163_vm5, %v332_v62, %v365_v63 }
 0x5cf   : > { %414 = vst [vmem:[%s380_s24 + $0x8] sm:$0xff] %v367_v3 }
 0x5d0 PF: > { %s7_s8 = sadd.s32 1, %s551_s8   ;;  %s672_s6 = smov %s547_s7 }
 0x5d1   : > { %p4_p5 = scmp.ge.s32.totalorder %s7_s8, 4   ;;  %s673_s7 = smov %s675_s10 }
 0x5d3   :  { %6 = sbr.rel (!%p4_p5) target bundleno = 2 (0x2), region = 131 }

// kernel: data_augmentation.1
= control target key start
LH: loop header
LB: loop body
LE: loop exit
PB: predicated region body
PF: predicated region fallthrough
CT: control target
= control target key end

     0   :  { %s1023_s18 = smov 0   ;;  %s1604_s0 = inlined_call_operand.vmem [shape: f32[2,3,256], index: 0, kind: input, shape index: {}]   ;;  %s1605_s1 = inlined_call_operand.vmem [shape: s32[2,4,256], index: 1, kind: input, shape index: {}]   ;;  %s1606_s2 = inlined_call_operand.vmem [shape: f32[2,4,256], index: 2, kind: input, shape index: {}]   ;;  %s1607_s3 = inlined_call_operand.vmem [shape: f32[2,3,3], index: 3, kind: input, shape index: {}]   ;;  %s1608_s4 = inlined_call_operand.vmem [shape: f32[2,3,1], index: 4, kind: input, shape index: {}]   ;;  %s1609_s5 = inlined_call_operand.vmem [shape: f32[2,3,256], index: 5, kind: output, shape index: {}]  }
   0x1 LB: > { %s929_s19 = sadd.s32 4294967295, %s986_s18   ;;  %p933_p0 = scmp.ge.s32.totalorder %s986_s18, 1  ;;  %s986_s18 = sphi %s1023_s18, %s15_s18  }
   0x2   : > { %p225_p1 = scmp.lt.s32.totalorder %s986_s18, 3 }
   0x4   : > { %p226_p2 = pnand %p933_p0, %p225_p1 }
   0x5   : > { %p271_p3 = scmp.lt.s32.totalorder (!%p226_p2), %s929_s19, 1  ;;  %s1166_s15 = smov (!%p226_p2), 0  }
   0x6   : > { %229 = sbr.rel (%p226_p2) target bundleno = 395 (0x18b), region = 40 }
   0xb   : > { %v299_v0 = vlaneseq  ;;  %v992_v1 = vmov 0   ;;  %s1611_s19 = smov (!%p271_p3, %s929_s19), 1  ;;  %vm348_vm0 = vcmask 1042432   ;;  %vm344_vm1 = vcmask 23552  }
   0xc   : > { %975 = vset.pattern.permute.xlu0 %v992_v1  ;;  %s1036_s20 = sshll.u32 %s1611_s19, 3  ;;  %s940_s21 = sshll.u32 %s1611_s19, 2 }
   0xd   : > { %v1033_v2 = vshrl.u32 %v299_v0, 7  ;;  %s275_s24 = scalar_lea.vmem %s1604_s0, %s1036_s20  ;;  %s280_s27 = scalar_lea.vmem %s1605_s1, %s1036_s20 }
   0xe   : > { %s285_s30 = scalar_lea.vmem %s1606_s2, %s1036_s20  ;;  %s298_s8 = scalar_lea.vmem %s1609_s5, %s1036_s20  ;;  %v333_v15 = vld [vmem:[%s275_s24] sm:$0x77] }
   0xf   : > { %v1039_v3 = vadd.s32 8, %v1033_v2  ;;  %v1042_v4 = vadd.s32 16, %v1033_v2  ;;  %v1045_v5 = vadd.s32 24, %v1033_v2  ;;  %v1048_v6 = vadd.s32 32, %v1033_v2  ;;  %341 = vst [vmem:[#allocation1] ss:$2 sm:$0xff] %v333_v15  ;;  %s293_s11 = scalar_lea.vmem %s1608_s4, %s940_s21  ;;  %s289_s14 = scalar_lea.vmem %s1607_s3, %s940_s21 }
  0x10   : > { %v1060_v7 = vadd.s32 40, %v1033_v2  ;;  %v1063_v8 = vadd.s32 48, %v1033_v2  ;;  %v1066_v9 = vadd.s32 56, %v1033_v2  ;;  %v1069_v10 = vadd.s32 64, %v1033_v2  ;;  %v334_v28 = vld [vmem:[%s293_s11] sm:$0x7] }
  0x11   : > { %v1080_v11 = vadd.s32 72, %v1033_v2  ;;  %v1083_v12 = vadd.s32 80, %v1033_v2  ;;  %v1086_v13 = vadd.s32 88, %v1033_v2  ;;  %v1089_v14 = vadd.s32 96, %v1033_v2  ;;  %337 = vperm.xlu0 %975, %v334_v28   ;;  %v332_v36 = vld [vmem:[%s289_s14] sm:$0x7] }
  0x12   : > { %v1092_v16 = vadd.s32 104, %v1033_v2  ;;  %v1095_v17 = vadd.s32 112, %v1033_v2  ;;  %v1098_v18 = vadd.s32 120, %v1033_v2  ;;  %v1101_v19 = vadd.s32 128, %v1033_v2 }
  0x13   : > { %v1109_v20 = vadd.s32 136, %v1033_v2  ;;  %v1112_v21 = vadd.s32 144, %v1033_v2  ;;  %v1115_v22 = vadd.s32 152, %v1033_v2  ;;  %v1118_v23 = vadd.s32 160, %v1033_v2 }
  0x14   : > { %v1121_v24 = vadd.s32 168, %v1033_v2  ;;  %v1124_v25 = vadd.s32 176, %v1033_v2  ;;  %v1127_v26 = vadd.s32 184, %v1033_v2  ;;  %v1130_v27 = vadd.s32 192, %v1033_v2 }
  0x15   : > { %v1133_v29 = vadd.s32 200, %v1033_v2  ;;  %v1136_v30 = vadd.s32 208, %v1033_v2  ;;  %v1139_v31 = vadd.s32 216, %v1033_v2  ;;  %v1142_v32 = vadd.s32 224, %v1033_v2 }
  0x16   : > { %v1150_v33 = vadd.s32 232, %v1033_v2  ;;  %v1153_v34 = vadd.s32 240, %v1033_v2  ;;  %v1156_v35 = vadd.s32 248, %v1033_v2  ;;  %v342_v37 = vld.sshfl [vmem:[#allocation1] sm:$0xff pattern:$0x75316420] }
  0x17   : > { %v343_v38 = vld.sshfl [vmem:[#allocation1 + $0x8] sm:$0xff pattern:$0x75316420]  ;;  %944 = vmatpush.msk.msra.mxu0 %vm348_vm0, %v342_v37 }
  0x18   : > { %946 = vmatpush.msk.msra.mxu1 %vm348_vm0, %v343_v38  ;;  %945 = vmatmul.msk.f32.vlgmr.msra.gmra.mxu0 %vm344_vm1, %v332_v36 }
  0x19   : > { %947 = vmatmul.msk.f32.vlgmr.msra.gmra.mxu1 %vm344_vm1, %v332_v36 }
  0x83   : > { %v338_v39 = vpop.permute.xlu0 %337 }
  0x95   : > { %v370_v40 = vpop.f32.mrf.mxu0 }
  0x96   : > { %v390_v41 = vpop.f32.mrf.mxu1  ;;  %v1158_v42 = vadd.f32 %v370_v40, %v338_v39 }
  0x97   : > { %v1160_v43 = vadd.f32 %v390_v41, %v338_v39 }
  0x98   : > { %v393_v44 = vpack.c.bf16 %v1158_v42, %v1158_v42 }
  0x99   : > { %v394_v45 = vpack.c.bf16 %v1160_v43, %v1160_v43 }
  0x9a LB: >> { %s948_s16 = sshll.u32 %s990_s15, 7  ;;  %s400_s15 = sadd.s32 1, %s990_s15   ;;  %s990_s15 = sphi %s1166_s15, %s400_s15  }
  0x9b   : >> { %s402_s17 = sshra.s32 %s948_s16, 7  ;;  %p397_p4 = scmp.ge.s32.totalorder %s400_s15, 2  }
  0x9c   : >> { %s1172_s19 = sshll.u32 %s402_s17, 2 }
  0x9d   : >> { %s405_s23 = scalar_lea.vmem %s280_s27, %s1172_s19  ;;  %s408_s26 = scalar_lea.vmem %s285_s30, %s1172_s19 }
  0x9e   : >> { %v406_v46 = vld [vmem:[%s405_s23] sm:$0xf]  ;;  %s813_s6 = scalar_lea.vmem %s298_s8, %s1172_s19 }
  0x9f   : >> { %v409_v47 = vld [vmem:[%s408_s26] sm:$0xf]  ;;  %v1186_v48 = vperm.slane %v406_v46, 0  ;;  %v1190_v50 = vperm.slane %v406_v46, 1  ;;  %v1194_v52 = vperm.slane %v406_v46, 2  ;;  %v1198_v54 = vperm.slane %v406_v46, 3 }
  0xa0   : >> { %v1188_v49 = vperm.slane %v409_v47, 0  ;;  %v1192_v51 = vperm.slane %v409_v47, 1  ;;  %v1196_v53 = vperm.slane %v409_v47, 2  ;;  %v1200_v55 = vperm.slane %v409_v47, 3 }
  0xa1   : >> { %vm425_vm2 = vcmp.eq.s32.totalorder %v1095_v17, %v1186_v48  ;;  %vm426_vm3 = vcmp.eq.s32.totalorder %v1098_v18, %v1186_v48  ;;  %vm491_vm4 = vcmp.eq.s32.totalorder %v1095_v17, %v1190_v50  ;;  %vm492_vm5 = vcmp.eq.s32.totalorder %v1098_v18, %v1190_v50 }
  0xa2   : >> { %v458_v56 = vsel %vm425_vm2, %v1188_v49, 0.0  ;;  %v459_v57 = vsel %vm426_vm3, %v1188_v49, 0.0  ;;  %v524_v58 = vsel %vm491_vm4, %v1192_v51, 0.0  ;;  %v525_v59 = vsel %vm492_vm5, %v1192_v51, 0.0 }
  0xa3   : >> { %v556_v60 = vadd.f32 %v524_v58, %v458_v56  ;;  %v557_v61 = vadd.f32 %v525_v59, %v459_v57  ;;  %vm589_vm6 = vcmp.eq.s32.totalorder %v1095_v17, %v1194_v52  ;;  %vm590_vm7 = vcmp.eq.s32.totalorder %v1098_v18, %v1194_v52 }
  0xa4   : >> { %v622_v62 = vsel %vm589_vm6, %v1196_v53, 0.0  ;;  %v623_v63 = vsel %vm590_vm7, %v1196_v53, 0.0  ;;  %vm687_vm8 = vcmp.eq.s32.totalorder %v1095_v17, %v1198_v54  ;;  %vm688_vm9 = vcmp.eq.s32.totalorder %v1098_v18, %v1198_v54 }
  0xa5   : >> { %v654_v0 = vadd.f32 %v622_v62, %v556_v60  ;;  %v655_v1 = vadd.f32 %v623_v63, %v557_v61  ;;  %v720_v15 = vsel %vm687_vm8, %v1200_v55, 0.0  ;;  %v721_v28 = vsel %vm688_vm9, %v1200_v55, 0.0 }
  0xa6   : >> { %vm441_vm10 = vcmp.eq.s32.totalorder %v1153_v34, %v1186_v48  ;;  %vm442_vm11 = vcmp.eq.s32.totalorder %v1156_v35, %v1186_v48  ;;  %vm507_vm12 = vcmp.eq.s32.totalorder %v1153_v34, %v1190_v50  ;;  %vm508_vm13 = vcmp.eq.s32.totalorder %v1156_v35, %v1190_v50 }
  0xa7   : >> { %v752_v36 = vadd.f32 %v720_v15, %v654_v0  ;;  %v753_v37 = vadd.f32 %v721_v28, %v655_v1  ;;  %v474_v38 = vsel %vm441_vm10, %v1188_v49, 0.0  ;;  %v475_v39 = vsel %vm442_vm11, %v1188_v49, 0.0 }
  0xa8   : >> { %v540_v40 = vsel %vm507_vm12, %v1192_v51, 0.0  ;;  %v541_v41 = vsel %vm508_vm13, %v1192_v51, 0.0  ;;  %vm605_vm14 = vcmp.eq.s32.totalorder %v1153_v34, %v1194_v52  ;;  %vm606_vm15 = vcmp.eq.s32.totalorder %v1156_v35, %v1194_v52 }
  0xa9   : >> { %v777_v46 = vpack.c.bf16 %v753_v37, %v752_v36  ;;  %v572_v47 = vadd.f32 %v540_v40, %v474_v38  ;;  %v573_v56 = vadd.f32 %v541_v41, %v475_v39  ;;  %v638_v57 = vsel %vm605_vm14, %v1196_v53, 0.0 }
  0xaa   : >> { %v639_v58 = vsel %vm606_vm15, %v1196_v53, 0.0  ;;  %vm703_vm0 = vcmp.eq.s32.totalorder %v1153_v34, %v1198_v54  ;;  %vm704_vm1 = vcmp.eq.s32.totalorder %v1156_v35, %v1198_v54  ;;  %vm423_vm2 = vcmp.eq.s32.totalorder %v1089_v14, %v1186_v48 }
  0xab   : >> { %786 = vmatpush.bf16.msra.mxu0 %v777_v46  ;;  %v670_v59 = vadd.f32 %v638_v57, %v572_v47  ;;  %v671_v60 = vadd.f32 %v639_v58, %v573_v56  ;;  %v736_v61 = vsel %vm703_vm0, %v1200_v55, 0.0  ;;  %v737_v62 = vsel %vm704_vm1, %v1200_v55, 0.0 }
  0xac   : >> { %vm424_vm3 = vcmp.eq.s32.totalorder %v1092_v16, %v1186_v48  ;;  %v456_v63 = vsel %vm423_vm2, %v1188_v49, 0.0  ;;  %vm489_vm4 = vcmp.eq.s32.totalorder %v1089_v14, %v1190_v50  ;;  %vm490_vm5 = vcmp.eq.s32.totalorder %v1092_v16, %v1190_v50 }
  0xad   : >> { %v768_v0 = vadd.f32 %v736_v61, %v670_v59  ;;  %v769_v1 = vadd.f32 %v737_v62, %v671_v60  ;;  %v457_v15 = vsel %vm424_vm3, %v1188_v49, 0.0  ;;  %v522_v28 = vsel %vm489_vm4, %v1192_v51, 0.0 }
  0xae   : >> { %v523_v36 = vsel %vm490_vm5, %v1192_v51, 0.0  ;;  %v554_v37 = vadd.f32 %v522_v28, %v456_v63  ;;  %vm587_vm6 = vcmp.eq.s32.totalorder %v1089_v14, %v1194_v52  ;;  %vm588_vm7 = vcmp.eq.s32.totalorder %v1092_v16, %v1194_v52 }
  0xaf   : >> { %v785_v38 = vpack.c.bf16 %v769_v1, %v768_v0  ;;  %v555_v39 = vadd.f32 %v523_v36, %v457_v15  ;;  %v620_v40 = vsel %vm587_vm6, %v1196_v53, 0.0  ;;  %v621_v41 = vsel %vm588_vm7, %v1196_v53, 0.0 }
  0xb0   : >> { %v652_v46 = vadd.f32 %v620_v40, %v554_v37  ;;  %vm685_vm8 = vcmp.eq.s32.totalorder %v1089_v14, %v1198_v54  ;;  %vm686_vm9 = vcmp.eq.s32.totalorder %v1092_v16, %v1198_v54  ;;  %vm439_vm10 = vcmp.eq.s32.totalorder %v1142_v32, %v1186_v48 }
  0xb1   : >> { %799 = vmatpush.bf16.msra.mxu1 %v785_v38  ;;  %v653_v47 = vadd.f32 %v621_v41, %v555_v39  ;;  %v718_v56 = vsel %vm685_vm8, %v1200_v55, 0.0  ;;  %v719_v57 = vsel %vm686_vm9, %v1200_v55, 0.0  ;;  %vm440_vm11 = vcmp.eq.s32.totalorder %v1150_v33, %v1186_v48 }
  0xb2   : >> { %v750_v58 = vadd.f32 %v718_v56, %v652_v46  ;;  %v472_v59 = vsel %vm439_vm10, %v1188_v49, 0.0  ;;  %v473_v60 = vsel %vm440_vm11, %v1188_v49, 0.0  ;;  %vm505_vm12 = vcmp.eq.s32.totalorder %v1142_v32, %v1190_v50 }
  0xb3   : >> { %v751_v61 = vadd.f32 %v719_v57, %v653_v47  ;;  %vm506_vm13 = vcmp.eq.s32.totalorder %v1150_v33, %v1190_v50  ;;  %v538_v62 = vsel %vm505_vm12, %v1192_v51, 0.0  ;;  %vm603_vm14 = vcmp.eq.s32.totalorder %v1142_v32, %v1194_v52 }
  0xb4   : >> { %v539_v63 = vsel %vm506_vm13, %v1192_v51, 0.0  ;;  %v570_v0 = vadd.f32 %v538_v62, %v472_v59  ;;  %vm604_vm15 = vcmp.eq.s32.totalorder %v1150_v33, %v1194_v52  ;;  %v636_v1 = vsel %vm603_vm14, %v1196_v53, 0.0 }
  0xb5   : >> { %v776_v15 = vpack.c.bf16 %v751_v61, %v750_v58  ;;  %v571_v28 = vadd.f32 %v539_v63, %v473_v60  ;;  %v637_v36 = vsel %vm604_vm15, %v1196_v53, 0.0  ;;  %vm701_vm0 = vcmp.eq.s32.totalorder %v1142_v32, %v1198_v54 }
  0xb6   : >> { %v668_v37 = vadd.f32 %v636_v1, %v570_v0  ;;  %vm702_vm1 = vcmp.eq.s32.totalorder %v1150_v33, %v1198_v54  ;;  %v734_v38 = vsel %vm701_vm0, %v1200_v55, 0.0  ;;  %vm421_vm2 = vcmp.eq.s32.totalorder %v1083_v12, %v1186_v48 }
  0xb7   : >> { %787 = vmatpush.bf16.msra.mxu0 %v776_v15  ;;  %v669_v39 = vadd.f32 %v637_v36, %v571_v28  ;;  %v735_v40 = vsel %vm702_vm1, %v1200_v55, 0.0  ;;  %vm422_vm3 = vcmp.eq.s32.totalorder %v1086_v13, %v1186_v48  ;;  %v454_v41 = vsel %vm421_vm2, %v1188_v49, 0.0 }
  0xb8   : >> { %v766_v46 = vadd.f32 %v734_v38, %v668_v37  ;;  %v455_v47 = vsel %vm422_vm3, %v1188_v49, 0.0  ;;  %vm487_vm4 = vcmp.eq.s32.totalorder %v1083_v12, %v1190_v50  ;;  %vm488_vm5 = vcmp.eq.s32.totalorder %v1086_v13, %v1190_v50 }
  0xb9   : >> { %v767_v56 = vadd.f32 %v735_v40, %v669_v39  ;;  %v520_v57 = vsel %vm487_vm4, %v1192_v51, 0.0  ;;  %v521_v58 = vsel %vm488_vm5, %v1192_v51, 0.0  ;;  %vm585_vm6 = vcmp.eq.s32.totalorder %v1083_v12, %v1194_v52 }
  0xba   : >> { %v552_v59 = vadd.f32 %v520_v57, %v454_v41  ;;  %v553_v60 = vadd.f32 %v521_v58, %v455_v47  ;;  %vm586_vm7 = vcmp.eq.s32.totalorder %v1086_v13, %v1194_v52  ;;  %v618_v61 = vsel %vm585_vm6, %v1196_v53, 0.0 }
  0xbb   : >> { %v784_v62 = vpack.c.bf16 %v767_v56, %v766_v46  ;;  %v619_v63 = vsel %vm586_vm7, %v1196_v53, 0.0  ;;  %vm683_vm8 = vcmp.eq.s32.totalorder %v1083_v12, %v1198_v54  ;;  %vm684_vm9 = vcmp.eq.s32.totalorder %v1086_v13, %v1198_v54 }
  0xbc   : >> { %v650_v0 = vadd.f32 %v618_v61, %v552_v59  ;;  %v651_v1 = vadd.f32 %v619_v63, %v553_v60  ;;  %v716_v15 = vsel %vm683_vm8, %v1200_v55, 0.0  ;;  %v717_v28 = vsel %vm684_vm9, %v1200_v55, 0.0 }
  0xbd   : >> { %800 = vmatpush.bf16.msra.mxu1 %v784_v62  ;;  %vm437_vm10 = vcmp.eq.s32.totalorder %v1136_v30, %v1186_v48  ;;  %vm438_vm11 = vcmp.eq.s32.totalorder %v1139_v31, %v1186_v48  ;;  %vm503_vm12 = vcmp.eq.s32.totalorder %v1136_v30, %v1190_v50  ;;  %vm504_vm13 = vcmp.eq.s32.totalorder %v1139_v31, %v1190_v50 }
  0xbe   : >> { %v748_v36 = vadd.f32 %v716_v15, %v650_v0  ;;  %v749_v37 = vadd.f32 %v717_v28, %v651_v1  ;;  %v470_v38 = vsel %vm437_vm10, %v1188_v49, 0.0  ;;  %v471_v39 = vsel %vm438_vm11, %v1188_v49, 0.0 }
  0xbf   : >> { %v536_v40 = vsel %vm503_vm12, %v1192_v51, 0.0  ;;  %v537_v41 = vsel %vm504_vm13, %v1192_v51, 0.0  ;;  %vm601_vm14 = vcmp.eq.s32.totalorder %v1136_v30, %v1194_v52  ;;  %vm602_vm15 = vcmp.eq.s32.totalorder %v1139_v31, %v1194_v52 }
  0xc0   : >> { %v775_v46 = vpack.c.bf16 %v749_v37, %v748_v36  ;;  %v568_v47 = vadd.f32 %v536_v40, %v470_v38  ;;  %v569_v56 = vadd.f32 %v537_v41, %v471_v39  ;;  %v634_v57 = vsel %vm601_vm14, %v1196_v53, 0.0 }
  0xc1   : >> { %v635_v58 = vsel %vm602_vm15, %v1196_v53, 0.0  ;;  %vm699_vm0 = vcmp.eq.s32.totalorder %v1136_v30, %v1198_v54  ;;  %vm700_vm1 = vcmp.eq.s32.totalorder %v1139_v31, %v1198_v54  ;;  %vm419_vm2 = vcmp.eq.s32.totalorder %v1069_v10, %v1186_v48 }
  0xc2   : >> { %788 = vmatpush.bf16.msra.mxu0 %v775_v46  ;;  %v666_v59 = vadd.f32 %v634_v57, %v568_v47  ;;  %v667_v60 = vadd.f32 %v635_v58, %v569_v56  ;;  %v732_v61 = vsel %vm699_vm0, %v1200_v55, 0.0  ;;  %v733_v62 = vsel %vm700_vm1, %v1200_v55, 0.0 }
  0xc3   : >> { %vm420_vm3 = vcmp.eq.s32.totalorder %v1080_v11, %v1186_v48  ;;  %v452_v63 = vsel %vm419_vm2, %v1188_v49, 0.0  ;;  %vm485_vm4 = vcmp.eq.s32.totalorder %v1069_v10, %v1190_v50  ;;  %vm486_vm5 = vcmp.eq.s32.totalorder %v1080_v11, %v1190_v50 }
  0xc4   : >> { %v764_v0 = vadd.f32 %v732_v61, %v666_v59  ;;  %v765_v1 = vadd.f32 %v733_v62, %v667_v60  ;;  %v453_v15 = vsel %vm420_vm3, %v1188_v49, 0.0  ;;  %v518_v28 = vsel %vm485_vm4, %v1192_v51, 0.0 }
  0xc5   : >> { %v519_v36 = vsel %vm486_vm5, %v1192_v51, 0.0  ;;  %v550_v37 = vadd.f32 %v518_v28, %v452_v63  ;;  %vm583_vm6 = vcmp.eq.s32.totalorder %v1069_v10, %v1194_v52  ;;  %vm584_vm7 = vcmp.eq.s32.totalorder %v1080_v11, %v1194_v52 }
  0xc6   : >> { %v783_v38 = vpack.c.bf16 %v765_v1, %v764_v0  ;;  %v551_v39 = vadd.f32 %v519_v36, %v453_v15  ;;  %v616_v40 = vsel %vm583_vm6, %v1196_v53, 0.0  ;;  %v617_v41 = vsel %vm584_vm7, %v1196_v53, 0.0 }
  0xc7   : >> { %v648_v46 = vadd.f32 %v616_v40, %v550_v37  ;;  %vm681_vm8 = vcmp.eq.s32.totalorder %v1069_v10, %v1198_v54  ;;  %vm682_vm9 = vcmp.eq.s32.totalorder %v1080_v11, %v1198_v54  ;;  %vm435_vm10 = vcmp.eq.s32.totalorder %v1130_v27, %v1186_v48 }
  0xc8   : >> { %801 = vmatpush.bf16.msra.mxu1 %v783_v38  ;;  %v649_v47 = vadd.f32 %v617_v41, %v551_v39  ;;  %v714_v56 = vsel %vm681_vm8, %v1200_v55, 0.0  ;;  %v715_v57 = vsel %vm682_vm9, %v1200_v55, 0.0  ;;  %vm436_vm11 = vcmp.eq.s32.totalorder %v1133_v29, %v1186_v48 }
  0xc9   : >> { %v746_v58 = vadd.f32 %v714_v56, %v648_v46  ;;  %v468_v59 = vsel %vm435_vm10, %v1188_v49, 0.0  ;;  %v469_v60 = vsel %vm436_vm11, %v1188_v49, 0.0  ;;  %vm501_vm12 = vcmp.eq.s32.totalorder %v1130_v27, %v1190_v50 }
  0xca   : >> { %v747_v61 = vadd.f32 %v715_v57, %v649_v47  ;;  %vm502_vm13 = vcmp.eq.s32.totalorder %v1133_v29, %v1190_v50  ;;  %v534_v62 = vsel %vm501_vm12, %v1192_v51, 0.0  ;;  %vm599_vm14 = vcmp.eq.s32.totalorder %v1130_v27, %v1194_v52 }
  0xcb   : >> { %v535_v63 = vsel %vm502_vm13, %v1192_v51, 0.0  ;;  %v566_v0 = vadd.f32 %v534_v62, %v468_v59  ;;  %vm600_vm15 = vcmp.eq.s32.totalorder %v1133_v29, %v1194_v52  ;;  %v632_v1 = vsel %vm599_vm14, %v1196_v53, 0.0 }
  0xcc   : >> { %v774_v15 = vpack.c.bf16 %v747_v61, %v746_v58  ;;  %v567_v28 = vadd.f32 %v535_v63, %v469_v60  ;;  %v633_v36 = vsel %vm600_vm15, %v1196_v53, 0.0  ;;  %vm697_vm0 = vcmp.eq.s32.totalorder %v1130_v27, %v1198_v54 }
  0xcd   : >> { %v664_v37 = vadd.f32 %v632_v1, %v566_v0  ;;  %vm698_vm1 = vcmp.eq.s32.totalorder %v1133_v29, %v1198_v54  ;;  %v730_v38 = vsel %vm697_vm0, %v1200_v55, 0.0  ;;  %vm417_vm2 = vcmp.eq.s32.totalorder %v1063_v8, %v1186_v48 }
  0xce   : >> { %789 = vmatpush.bf16.msra.mxu0 %v774_v15  ;;  %v665_v39 = vadd.f32 %v633_v36, %v567_v28  ;;  %v731_v40 = vsel %vm698_vm1, %v1200_v55, 0.0  ;;  %vm418_vm3 = vcmp.eq.s32.totalorder %v1066_v9, %v1186_v48  ;;  %v450_v41 = vsel %vm417_vm2, %v1188_v49, 0.0 }
  0xcf   : >> { %v762_v46 = vadd.f32 %v730_v38, %v664_v37  ;;  %v451_v47 = vsel %vm418_vm3, %v1188_v49, 0.0  ;;  %vm483_vm4 = vcmp.eq.s32.totalorder %v1063_v8, %v1190_v50  ;;  %vm484_vm5 = vcmp.eq.s32.totalorder %v1066_v9, %v1190_v50 }
  0xd0   : >> { %v763_v56 = vadd.f32 %v731_v40, %v665_v39  ;;  %v516_v57 = vsel %vm483_vm4, %v1192_v51, 0.0  ;;  %v517_v58 = vsel %vm484_vm5, %v1192_v51, 0.0  ;;  %vm581_vm6 = vcmp.eq.s32.totalorder %v1063_v8, %v1194_v52 }
  0xd1   : >> { %v548_v59 = vadd.f32 %v516_v57, %v450_v41  ;;  %v549_v60 = vadd.f32 %v517_v58, %v451_v47  ;;  %vm582_vm7 = vcmp.eq.s32.totalorder %v1066_v9, %v1194_v52  ;;  %v614_v61 = vsel %vm581_vm6, %v1196_v53, 0.0 }
  0xd2   : >> { %v782_v62 = vpack.c.bf16 %v763_v56, %v762_v46  ;;  %v615_v63 = vsel %vm582_vm7, %v1196_v53, 0.0  ;;  %vm679_vm8 = vcmp.eq.s32.totalorder %v1063_v8, %v1198_v54  ;;  %vm680_vm9 = vcmp.eq.s32.totalorder %v1066_v9, %v1198_v54 }
  0xd3   : >> { %v646_v0 = vadd.f32 %v614_v61, %v548_v59  ;;  %v647_v1 = vadd.f32 %v615_v63, %v549_v60  ;;  %v712_v15 = vsel %vm679_vm8, %v1200_v55, 0.0  ;;  %v713_v28 = vsel %vm680_vm9, %v1200_v55, 0.0 }
  0xd4   : >> { %802 = vmatpush.bf16.msra.mxu1 %v782_v62  ;;  %vm433_vm10 = vcmp.eq.s32.totalorder %v1124_v25, %v1186_v48  ;;  %vm434_vm11 = vcmp.eq.s32.totalorder %v1127_v26, %v1186_v48  ;;  %vm499_vm12 = vcmp.eq.s32.totalorder %v1124_v25, %v1190_v50  ;;  %vm500_vm13 = vcmp.eq.s32.totalorder %v1127_v26, %v1190_v50 }
  0xd5   : >> { %v744_v36 = vadd.f32 %v712_v15, %v646_v0  ;;  %v745_v37 = vadd.f32 %v713_v28, %v647_v1  ;;  %v466_v38 = vsel %vm433_vm10, %v1188_v49, 0.0  ;;  %v467_v39 = vsel %vm434_vm11, %v1188_v49, 0.0 }
  0xd6   : >> { %v532_v40 = vsel %vm499_vm12, %v1192_v51, 0.0  ;;  %v533_v41 = vsel %vm500_vm13, %v1192_v51, 0.0  ;;  %vm597_vm14 = vcmp.eq.s32.totalorder %v1124_v25, %v1194_v52  ;;  %vm598_vm15 = vcmp.eq.s32.totalorder %v1127_v26, %v1194_v52 }
  0xd7   : >> { %v773_v46 = vpack.c.bf16 %v745_v37, %v744_v36  ;;  %v564_v47 = vadd.f32 %v532_v40, %v466_v38  ;;  %v565_v56 = vadd.f32 %v533_v41, %v467_v39  ;;  %v630_v57 = vsel %vm597_vm14, %v1196_v53, 0.0 }
  0xd8   : >> { %v631_v58 = vsel %vm598_vm15, %v1196_v53, 0.0  ;;  %vm695_vm0 = vcmp.eq.s32.totalorder %v1124_v25, %v1198_v54  ;;  %vm696_vm1 = vcmp.eq.s32.totalorder %v1127_v26, %v1198_v54  ;;  %vm415_vm2 = vcmp.eq.s32.totalorder %v1048_v6, %v1186_v48 }
  0xd9   : >> { %790 = vmatpush.bf16.msra.mxu0 %v773_v46  ;;  %v662_v59 = vadd.f32 %v630_v57, %v564_v47  ;;  %v663_v60 = vadd.f32 %v631_v58, %v565_v56  ;;  %v728_v61 = vsel %vm695_vm0, %v1200_v55, 0.0  ;;  %v729_v62 = vsel %vm696_vm1, %v1200_v55, 0.0 }
  0xda   : >> { %vm416_vm3 = vcmp.eq.s32.totalorder %v1060_v7, %v1186_v48  ;;  %v448_v63 = vsel %vm415_vm2, %v1188_v49, 0.0  ;;  %vm481_vm4 = vcmp.eq.s32.totalorder %v1048_v6, %v1190_v50  ;;  %vm482_vm5 = vcmp.eq.s32.totalorder %v1060_v7, %v1190_v50 }
  0xdb   : >> { %v760_v0 = vadd.f32 %v728_v61, %v662_v59  ;;  %v761_v1 = vadd.f32 %v729_v62, %v663_v60  ;;  %v449_v15 = vsel %vm416_vm3, %v1188_v49, 0.0  ;;  %v514_v28 = vsel %vm481_vm4, %v1192_v51, 0.0 }
  0xdc   : >> { %v515_v36 = vsel %vm482_vm5, %v1192_v51, 0.0  ;;  %v546_v37 = vadd.f32 %v514_v28, %v448_v63  ;;  %vm579_vm6 = vcmp.eq.s32.totalorder %v1048_v6, %v1194_v52  ;;  %vm580_vm7 = vcmp.eq.s32.totalorder %v1060_v7, %v1194_v52 }
  0xdd   : >> { %v781_v38 = vpack.c.bf16 %v761_v1, %v760_v0  ;;  %v547_v39 = vadd.f32 %v515_v36, %v449_v15  ;;  %v612_v40 = vsel %vm579_vm6, %v1196_v53, 0.0  ;;  %v613_v41 = vsel %vm580_vm7, %v1196_v53, 0.0 }
  0xde   : >> { %v644_v46 = vadd.f32 %v612_v40, %v546_v37  ;;  %vm677_vm8 = vcmp.eq.s32.totalorder %v1048_v6, %v1198_v54  ;;  %vm678_vm9 = vcmp.eq.s32.totalorder %v1060_v7, %v1198_v54  ;;  %vm431_vm10 = vcmp.eq.s32.totalorder %v1118_v23, %v1186_v48 }
  0xdf   : >> { %803 = vmatpush.bf16.msra.mxu1 %v781_v38  ;;  %v645_v47 = vadd.f32 %v613_v41, %v547_v39  ;;  %v710_v56 = vsel %vm677_vm8, %v1200_v55, 0.0  ;;  %v711_v57 = vsel %vm678_vm9, %v1200_v55, 0.0  ;;  %vm432_vm11 = vcmp.eq.s32.totalorder %v1121_v24, %v1186_v48 }
  0xe0   : >> { %v742_v58 = vadd.f32 %v710_v56, %v644_v46  ;;  %v464_v59 = vsel %vm431_vm10, %v1188_v49, 0.0  ;;  %v465_v60 = vsel %vm432_vm11, %v1188_v49, 0.0  ;;  %vm497_vm12 = vcmp.eq.s32.totalorder %v1118_v23, %v1190_v50 }
  0xe1   : >> { %v743_v61 = vadd.f32 %v711_v57, %v645_v47  ;;  %vm498_vm13 = vcmp.eq.s32.totalorder %v1121_v24, %v1190_v50  ;;  %v530_v62 = vsel %vm497_vm12, %v1192_v51, 0.0  ;;  %vm595_vm14 = vcmp.eq.s32.totalorder %v1118_v23, %v1194_v52 }
  0xe2   : >> { %v531_v63 = vsel %vm498_vm13, %v1192_v51, 0.0  ;;  %v562_v0 = vadd.f32 %v530_v62, %v464_v59  ;;  %vm596_vm15 = vcmp.eq.s32.totalorder %v1121_v24, %v1194_v52  ;;  %v628_v1 = vsel %vm595_vm14, %v1196_v53, 0.0 }
  0xe3   : >> { %v772_v15 = vpack.c.bf16 %v743_v61, %v742_v58  ;;  %v563_v28 = vadd.f32 %v531_v63, %v465_v60  ;;  %v629_v36 = vsel %vm596_vm15, %v1196_v53, 0.0  ;;  %vm693_vm0 = vcmp.eq.s32.totalorder %v1118_v23, %v1198_v54 }
  0xe4   : >> { %v660_v37 = vadd.f32 %v628_v1, %v562_v0  ;;  %vm694_vm1 = vcmp.eq.s32.totalorder %v1121_v24, %v1198_v54  ;;  %v726_v38 = vsel %vm693_vm0, %v1200_v55, 0.0  ;;  %vm413_vm2 = vcmp.eq.s32.totalorder %v1042_v4, %v1186_v48 }
  0xe5   : >> { %791 = vmatpush.bf16.msra.mxu0 %v772_v15  ;;  %v661_v39 = vadd.f32 %v629_v36, %v563_v28  ;;  %v727_v40 = vsel %vm694_vm1, %v1200_v55, 0.0  ;;  %vm414_vm3 = vcmp.eq.s32.totalorder %v1045_v5, %v1186_v48  ;;  %v446_v41 = vsel %vm413_vm2, %v1188_v49, 0.0 }
  0xe6   : >> { %v758_v46 = vadd.f32 %v726_v38, %v660_v37  ;;  %v447_v47 = vsel %vm414_vm3, %v1188_v49, 0.0  ;;  %vm479_vm4 = vcmp.eq.s32.totalorder %v1042_v4, %v1190_v50  ;;  %vm480_vm5 = vcmp.eq.s32.totalorder %v1045_v5, %v1190_v50 }
  0xe7   : >> { %v759_v56 = vadd.f32 %v727_v40, %v661_v39  ;;  %v512_v57 = vsel %vm479_vm4, %v1192_v51, 0.0  ;;  %v513_v58 = vsel %vm480_vm5, %v1192_v51, 0.0  ;;  %vm577_vm6 = vcmp.eq.s32.totalorder %v1042_v4, %v1194_v52 }
  0xe8   : >> { %v544_v59 = vadd.f32 %v512_v57, %v446_v41  ;;  %v545_v60 = vadd.f32 %v513_v58, %v447_v47  ;;  %vm578_vm7 = vcmp.eq.s32.totalorder %v1045_v5, %v1194_v52  ;;  %v610_v61 = vsel %vm577_vm6, %v1196_v53, 0.0 }
  0xe9   : >> { %v780_v62 = vpack.c.bf16 %v759_v56, %v758_v46  ;;  %v611_v63 = vsel %vm578_vm7, %v1196_v53, 0.0  ;;  %vm675_vm8 = vcmp.eq.s32.totalorder %v1042_v4, %v1198_v54  ;;  %vm676_vm9 = vcmp.eq.s32.totalorder %v1045_v5, %v1198_v54 }
  0xea   : >> { %v642_v0 = vadd.f32 %v610_v61, %v544_v59  ;;  %v643_v1 = vadd.f32 %v611_v63, %v545_v60  ;;  %v708_v15 = vsel %vm675_vm8, %v1200_v55, 0.0  ;;  %v709_v28 = vsel %vm676_vm9, %v1200_v55, 0.0 }
  0xeb   : >> { %804 = vmatpush.bf16.msra.mxu1 %v780_v62  ;;  %vm429_vm10 = vcmp.eq.s32.totalorder %v1112_v21, %v1186_v48  ;;  %vm430_vm11 = vcmp.eq.s32.totalorder %v1115_v22, %v1186_v48  ;;  %vm495_vm12 = vcmp.eq.s32.totalorder %v1112_v21, %v1190_v50  ;;  %vm496_vm13 = vcmp.eq.s32.totalorder %v1115_v22, %v1190_v50 }
  0xec   : >> { %v740_v36 = vadd.f32 %v708_v15, %v642_v0  ;;  %v741_v37 = vadd.f32 %v709_v28, %v643_v1  ;;  %v462_v38 = vsel %vm429_vm10, %v1188_v49, 0.0  ;;  %v463_v39 = vsel %vm430_vm11, %v1188_v49, 0.0 }
  0xed   : >> { %v528_v40 = vsel %vm495_vm12, %v1192_v51, 0.0  ;;  %v529_v41 = vsel %vm496_vm13, %v1192_v51, 0.0  ;;  %vm593_vm14 = vcmp.eq.s32.totalorder %v1112_v21, %v1194_v52  ;;  %vm594_vm15 = vcmp.eq.s32.totalorder %v1115_v22, %v1194_v52 }
  0xee   : >> { %v771_v46 = vpack.c.bf16 %v741_v37, %v740_v36  ;;  %v560_v47 = vadd.f32 %v528_v40, %v462_v38  ;;  %v561_v56 = vadd.f32 %v529_v41, %v463_v39  ;;  %v626_v57 = vsel %vm593_vm14, %v1196_v53, 0.0 }
  0xef   : >> { %v627_v58 = vsel %vm594_vm15, %v1196_v53, 0.0  ;;  %vm691_vm0 = vcmp.eq.s32.totalorder %v1112_v21, %v1198_v54  ;;  %vm692_vm1 = vcmp.eq.s32.totalorder %v1115_v22, %v1198_v54  ;;  %vm411_vm2 = vcmp.eq.s32.totalorder %v1033_v2, %v1186_v48 }
  0xf0   : >> { %792 = vmatpush.bf16.msra.mxu0 %v771_v46  ;;  %v658_v59 = vadd.f32 %v626_v57, %v560_v47  ;;  %v659_v60 = vadd.f32 %v627_v58, %v561_v56  ;;  %v724_v61 = vsel %vm691_vm0, %v1200_v55, 0.0  ;;  %v725_v62 = vsel %vm692_vm1, %v1200_v55, 0.0 }
  0xf1   : >> { %vm412_vm3 = vcmp.eq.s32.totalorder %v1039_v3, %v1186_v48  ;;  %v444_v63 = vsel %vm411_vm2, %v1188_v49, 0.0  ;;  %vm477_vm4 = vcmp.eq.s32.totalorder %v1033_v2, %v1190_v50  ;;  %vm478_vm5 = vcmp.eq.s32.totalorder %v1039_v3, %v1190_v50 }
  0xf2   : >> { %v756_v0 = vadd.f32 %v724_v61, %v658_v59  ;;  %v757_v1 = vadd.f32 %v725_v62, %v659_v60  ;;  %v445_v15 = vsel %vm412_vm3, %v1188_v49, 0.0  ;;  %v510_v28 = vsel %vm477_vm4, %v1192_v51, 0.0 }
  0xf3   : >> { %v511_v36 = vsel %vm478_vm5, %v1192_v51, 0.0  ;;  %v542_v37 = vadd.f32 %v510_v28, %v444_v63  ;;  %vm575_vm6 = vcmp.eq.s32.totalorder %v1033_v2, %v1194_v52  ;;  %vm576_vm7 = vcmp.eq.s32.totalorder %v1039_v3, %v1194_v52 }
  0xf4   : >> { %v779_v38 = vpack.c.bf16 %v757_v1, %v756_v0  ;;  %v543_v39 = vadd.f32 %v511_v36, %v445_v15  ;;  %v608_v40 = vsel %vm575_vm6, %v1196_v53, 0.0  ;;  %v609_v41 = vsel %vm576_vm7, %v1196_v53, 0.0 }
  0xf5   : >> { %v640_v46 = vadd.f32 %v608_v40, %v542_v37  ;;  %vm673_vm8 = vcmp.eq.s32.totalorder %v1033_v2, %v1198_v54  ;;  %vm674_vm9 = vcmp.eq.s32.totalorder %v1039_v3, %v1198_v54  ;;  %vm427_vm10 = vcmp.eq.s32.totalorder %v1101_v19, %v1186_v48 }
  0xf6   : >> { %805 = vmatpush.bf16.msra.mxu1 %v779_v38  ;;  %v641_v47 = vadd.f32 %v609_v41, %v543_v39  ;;  %v706_v56 = vsel %vm673_vm8, %v1200_v55, 0.0  ;;  %v707_v57 = vsel %vm674_vm9, %v1200_v55, 0.0  ;;  %vm428_vm11 = vcmp.eq.s32.totalorder %v1109_v20, %v1186_v48 }
  0xf7   : >> { %v738_v58 = vadd.f32 %v706_v56, %v640_v46  ;;  %v460_v59 = vsel %vm427_vm10, %v1188_v49, 0.0  ;;  %v461_v60 = vsel %vm428_vm11, %v1188_v49, 0.0  ;;  %vm493_vm12 = vcmp.eq.s32.totalorder %v1101_v19, %v1190_v50 }
  0xf8   : >> { %v739_v61 = vadd.f32 %v707_v57, %v641_v47  ;;  %vm494_vm13 = vcmp.eq.s32.totalorder %v1109_v20, %v1190_v50  ;;  %v526_v62 = vsel %vm493_vm12, %v1192_v51, 0.0  ;;  %vm591_vm14 = vcmp.eq.s32.totalorder %v1101_v19, %v1194_v52 }
  0xf9   : >> { %v527_v63 = vsel %vm494_vm13, %v1192_v51, 0.0  ;;  %v558_v48 = vadd.f32 %v526_v62, %v460_v59  ;;  %vm592_vm15 = vcmp.eq.s32.totalorder %v1109_v20, %v1194_v52  ;;  %v624_v49 = vsel %vm591_vm14, %v1196_v53, 0.0 }
  0xfa   : >> { %v770_v0 = vpack.c.bf16 %v739_v61, %v738_v58  ;;  %v559_v1 = vadd.f32 %v527_v63, %v461_v60  ;;  %v625_v15 = vsel %vm592_vm15, %v1196_v53, 0.0  ;;  %vm689_vm0 = vcmp.eq.s32.totalorder %v1101_v19, %v1198_v54 }
  0xfb   : >> { %v656_v50 = vadd.f32 %v624_v49, %v558_v48  ;;  %vm690_vm1 = vcmp.eq.s32.totalorder %v1109_v20, %v1198_v54  ;;  %v722_v51 = vsel %vm689_vm0, %v1200_v55, 0.0 }
  0xfc   : >> { %793 = vmatpush.bf16.msra.mxu0 %v770_v0  ;;  %v657_v28 = vadd.f32 %v625_v15, %v559_v1  ;;  %v723_v52 = vsel %vm690_vm1, %v1200_v55, 0.0 }
  0xfd   : >> { %v754_v36 = vadd.f32 %v722_v51, %v656_v50 }
  0xfe   : >> { %v755_v37 = vadd.f32 %v723_v52, %v657_v28 }
  0xff   : >> { %794 = vmatmul.bf16.vlgmr.msra.gmra.mxu0 %v393_v44 }
 0x100   : >> { %v778_v53 = vpack.c.bf16 %v755_v37, %v754_v36 }
 0x102   : >> { %806 = vmatpush.bf16.msra.mxu1 %v778_v53 }
 0x105   : >> { %807 = vmatmul.bf16.vlgmr.msra.gmra.mxu1 %v394_v45 }
 0x17c   : >> { %v795_v38 = vpop.f32.mrf.mxu0 }
 0x182   : >> { %v808_v54 = vpop.f32.mrf.mxu1 }
 0x183   : >> { %v809_v55 = vadd.f32 %v808_v54, %v795_v38 }
 0x184   : >> { %v797_v39 = vpop.f32.mrf.mxu0 }
 0x185   : >> { %814 = vst [vmem:[%s813_s6] sm:$0x7] %v809_v55 }
 0x186   : > { %399 = sbr.rel (!%p397_p4) target bundleno = 154 (0x9a), region = 92 }
 0x18a   : >> { %v810_v40 = vpop.f32.mrf.mxu1 }
 0x18b PF: > { %s15_s18 = sadd.s32 1, %s986_s18  }
 0x18c   : > { %p12_p5 = scmp.ge.s32.totalorder %s15_s18, 4  }
 0x18e   :  { %14 = sbr.rel (!%p12_p5) target bundleno = 1 (0x1), region = 103 }

</bundles_post_ra>
